<compile_context>
chip_gen: v5e
topology: v5e:2x2
jax: 0.10.0
libtpu: 0.0.40
codegen_flags: <defaults>
</compile_context>

<pallas_src>
import functools

import jax
import jax.numpy as jnp
from jax.experimental import pallas as pl
from jax.experimental.pallas import tpu as pltpu


# -----------------------------------------------------------------------------
# Generation-aware VMEM budgeting (v5e/v6e: 128 MiB, v7x: 64 MiB per TC)
# -----------------------------------------------------------------------------
def _vmem_capacity_bytes():
    try:
        return int(pltpu.get_tpu_info().vmem_capacity_bytes)
    except Exception:
        return 64 * 1024 * 1024


_VMEM_CAP = _vmem_capacity_bytes()
_VMEM_LIMIT = int(min(_VMEM_CAP * 0.7, 100 * 1024 * 1024))
_TILE_BUDGET = _VMEM_CAP // 3


# -----------------------------------------------------------------------------
# Pallas kernels
# -----------------------------------------------------------------------------
def _embed_kernel(x_ref, wf_ref, bf_ref, wh_ref, bh_ref, feat_ref, heads_ref):
    """One embedding net per grid step: feat = x@Wf+bf ; heads = feat@Wh+bh."""
    x = x_ref[...]                                            # (B, K) bf16
    feat = jnp.dot(x, wf_ref[0, :, :],
                   preferred_element_type=jnp.float32) + bf_ref[0, :, :]
    feat_ref[0, :, :] = feat
    heads_ref[0, :, :] = (
        jnp.dot(feat.astype(jnp.bfloat16), wh_ref[0, :, :],
                preferred_element_type=jnp.float32) + bh_ref[0, :, :])


def _verify_kernel(l_ref, r_ref, w_ref, b_ref, o_ref):
    """Fc_ClassBlock.classifier (eval): ((l - r)^2) @ Wc_pad + bc_pad."""
    d = l_ref[...] - r_ref[...]
    o_ref[...] = (
        jnp.dot(d * d, w_ref[...], preferred_element_type=jnp.float32)
        + b_ref[...]).astype(o_ref.dtype)


def _convt_subpixel_kernel(x_ref, w_ref, sh_ref,
                           ee_ref, eo_ref, oe_ref, oo_ref, *, leaky):
    """ConvTranspose2d(k3,s2,p1,op1) + BN (+LeakyReLU 0.1) via sub-pixel phases.

    x_ref : (bt, H+1, W+1, Cin) bf16, zero row/col appended (boundary taps).
    w_ref : (9, Cin, Cout) bf16, tap index = kh*3+kw, BN scale pre-folded.
    sh_ref: (1, Cout) f32  (BN shift).
    Outputs: the four output-pixel phases (even/odd row x even/odd col), each
    (bt, H, W, Cout) bf16 (f32 accumulation in-kernel).
    """
    bt, hp1, wp1, cin = x_ref.shape
    h, w = hp1 - 1, wp1 - 1
    cout = w_ref.shape[2]
    rows = bt * h * w

    # Four shifted windows of the (zero-padded) activation, straight from VMEM.
    x00 = x_ref[:, 0:h, 0:w, :].reshape(rows, cin)
    x01 = x_ref[:, 0:h, 1:wp1, :].reshape(rows, cin)
    x10 = x_ref[:, 1:hp1, 0:w, :].reshape(rows, cin)
    x11 = x_ref[:, 1:hp1, 1:wp1, :].reshape(rows, cin)

    shift = sh_ref[...]                                       # (1, Cout) f32

    def tap(xv, k):
        return jnp.dot(xv, w_ref[k], preferred_element_type=jnp.float32)

    def emit(acc, o_ref):
        y = acc + shift
        if leaky:
            y = jnp.where(y >= 0.0, y, 0.1 * y)                # LeakyReLU(0.1)
        o_ref[...] = y.astype(o_ref.dtype).reshape(bt, h, w, cout)

    # y[2a  ,2b  ] = x[a  ,b  ]W11
    emit(tap(x00, 4), ee_ref)
    # y[2a  ,2b+1] = x[a  ,b+1]W10 + x[a  ,b  ]W12
    emit(tap(x01, 3) + tap(x00, 5), eo_ref)
    # y[2a+1,2b  ] = x[a+1,b  ]W01 + x[a  ,b  ]W21
    emit(tap(x10, 1) + tap(x00, 7), oe_ref)
    # y[2a+1,2b+1] = x[a+1,b+1]W00 + x[a+1,b]W02 + x[a,b+1]W20 + x[a,b]W22
    emit(tap(x11, 0) + tap(x10, 2) + tap(x01, 6) + tap(x00, 8), oo_ref)


# -----------------------------------------------------------------------------
# pallas_call wrappers
# -----------------------------------------------------------------------------
def _embed_multi(x_flat, wf, bf, wh, bh):
    """Run E stacked embedding nets on the same (B, K) input in one pallas_call."""
    E, K, D = wf.shape
    B = x_flat.shape[0]
    NH = wh.shape[2]
    feat, heads = pl.pallas_call(
        _embed_kernel,
        out_shape=(jax.ShapeDtypeStruct((E, B, D), jnp.float32),
                   jax.ShapeDtypeStruct((E, B, NH), jnp.float32)),
        grid=(E,),
        in_specs=[
            pl.BlockSpec((B, K), lambda e: (0, 0)),           # x resident across grid
            pl.BlockSpec((1, K, D), lambda e: (e, 0, 0)),
            pl.BlockSpec((1, 1, D), lambda e: (e, 0, 0)),
            pl.BlockSpec((1, D, NH), lambda e: (e, 0, 0)),
            pl.BlockSpec((1, 1, NH), lambda e: (e, 0, 0)),
        ],
        out_specs=(
            pl.BlockSpec((1, B, D), lambda e: (e, 0, 0)),
            pl.BlockSpec((1, B, NH), lambda e: (e, 0, 0)),
        ),
        compiler_params=pltpu.CompilerParams(
            dimension_semantics=("parallel",)),
    )(x_flat, wf, bf, wh, bh)
    return feat, heads


def _verify_classify(left, right, wc_pad, bc_pad):
    """All six squared-difference pairs through Linear(512, 2) in one call."""
    M, D = left.shape
    npad = wc_pad.shape[1]
    return pl.pallas_call(
        _verify_kernel,
        out_shape=jax.ShapeDtypeStruct((M, npad), jnp.float32),
        grid=(1,),
        in_specs=[
            pl.BlockSpec((M, D), lambda i: (0, 0)),
            pl.BlockSpec((M, D), lambda i: (0, 0)),
            pl.BlockSpec((D, npad), lambda i: (0, 0)),
            pl.BlockSpec((1, npad), lambda i: (0, 0)),
        ],
        out_specs=pl.BlockSpec((M, npad), lambda i: (0, 0)),
    )(left, right, wc_pad, bc_pad)


def _divisors_desc(n):
    ds = set()
    i = 1
    while i * i <= n:
        if n % i == 0:
            ds.add(i)
            ds.add(n // i)
        i += 1
    return sorted(ds, reverse=True)


def _pick_bt(mtot, h, w, cin, cout):
    """Largest batch tile (a divisor of mtot -> no operand padding) within budget."""
    per = (2 * (h + 1) * (w + 1) * cin * 2       # double-buffered padded input block
           + 4 * h * w * cin * 2                 # four shifted window loads
           + 4 * h * w * cout * 4                # four f32 phase accumulators
           + 2 * 4 * h * w * cout * 2)           # double-buffered bf16 phase outputs
    fixed = 2 * (9 * cin * cout * 2 + cout * 4)  # resident weights + shift
    budget = max(_TILE_BUDGET - fixed, per)
    divs = _divisors_desc(mtot)
    for d in divs:                               # prefer grid >= 2 (megacore / pipeline)
        if (mtot == 1 or d <= mtot // 2) and d * per <= budget:
            return d
    for d in divs:
        if d * per <= budget:
            return d
    return 1


def _convt_layer(x_pad, w9, shift, leaky):
    """One decoder layer on a padded NHWC activation -> four bf16 output phases."""
    mtot, hp1, wp1, cin = x_pad.shape
    h, w = hp1 - 1, wp1 - 1
    cout = w9.shape[2]
    bt = _pick_bt(mtot, h, w, cin, cout)
    phase = jax.ShapeDtypeStruct((mtot, h, w, cout), jnp.bfloat16)
    return pl.pallas_call(
        functools.partial(_convt_subpixel_kernel, leaky=leaky),
        out_shape=(phase, phase, phase, phase),
        grid=(mtot // bt,),
        in_specs=[
            pl.BlockSpec((bt, hp1, wp1, cin), lambda m: (m, 0, 0, 0)),
            pl.BlockSpec((9, cin, cout), lambda m: (0, 0, 0)),
            pl.BlockSpec((1, cout), lambda m: (0, 0)),
        ],
        out_specs=tuple(
            pl.BlockSpec((bt, h, w, cout), lambda m: (m, 0, 0, 0))
            for _ in range(4)),
        compiler_params=pltpu.CompilerParams(
            dimension_semantics=("parallel",),
            vmem_limit_bytes=_VMEM_LIMIT),
    )(x_pad, w9, shift)


def _interleave_phases(ee, eo, oe, oo):
    """(M,H,W,C) x4 phases -> (M,2H,2W,C).  XLA-side layout plumbing only."""
    m, h, w, c = ee.shape
    row_e = jnp.stack([ee, eo], axis=3).reshape(m, h, 2 * w, c)
    row_o = jnp.stack([oe, oo], axis=3).reshape(m, h, 2 * w, c)
    return jnp.stack([row_e, row_o], axis=2).reshape(m, 2 * h, 2 * w, c)


def _decoder_forward(dec_params, x_nchw):
    """decoder(): five ConvTranspose+BN(+LeakyReLU) layers via the Pallas kernel."""
    x = jnp.transpose(x_nchw, (0, 2, 3, 1)).astype(jnp.bfloat16)
    n = len(dec_params)
    for li, layer in enumerate(dec_params):
        xp = jnp.pad(x, ((0, 0), (0, 1), (0, 1), (0, 0)))     # boundary taps = 0
        ee, eo, oe, oo = _convt_layer(xp, layer["w9"], layer["shift"],
                                      leaky=(li < n - 1))
        x = _interleave_phases(ee, eo, oe, oo)
    return jnp.transpose(x, (0, 3, 1, 2)).astype(jnp.float32)


# -----------------------------------------------------------------------------
# Pure-JAX references (true transposed-conv semantics, for correctness checks)
# -----------------------------------------------------------------------------
def _convt_layer_ref(x_nhwc, w9, shift, leaky):
    """ConvTranspose2d(k3,s2,p1,op1,bias=False)+BN(eval)(+LeakyReLU 0.1) reference
    via lhs-dilated conv with the spatially flipped kernel."""
    cin, cout = w9.shape[1], w9.shape[2]
    w_hwio = jnp.flip(w9.reshape(3, 3, cin, cout), axis=(0, 1))
    y = jax.lax.conv_general_dilated(
        x_nhwc.astype(jnp.bfloat16), w_hwio,
        window_strides=(1, 1), padding=((1, 2), (1, 2)), lhs_dilation=(2, 2),
        dimension_numbers=("NHWC", "HWIO", "NHWC"),
        preferred_element_type=jnp.float32)
    y = y + shift.reshape(1, 1, 1, cout)
    if leaky:
        y = jnp.where(y >= 0.0, y, 0.1 * y)
    return y


def _decoder_ref(dec_params, x_nchw):
    x = jnp.transpose(x_nchw, (0, 2, 3, 1)).astype(jnp.bfloat16)
    n = len(dec_params)
    for li, layer in enumerate(dec_params):
        y = _convt_layer_ref(x, layer["w9"], layer["shift"], leaky=(li < n - 1))
        x = y.astype(jnp.bfloat16)
    return jnp.transpose(x, (0, 3, 1, 2)).astype(jnp.float32)


# -----------------------------------------------------------------------------
# Auto_Encoder_six forward
# -----------------------------------------------------------------------------
def make_forward(cfg):
    nc = cfg["n_classes"]
    ncpad = cfg["nc_pad"]
    c_mid = cfg["c_mid"]
    hm, wm = cfg["hm"], cfg["wm"]

    @functools.partial(jax.jit, static_argnames=("train",))
    def forward(params, x, train=False):
        B = x.shape[0]
        x_flat = x.reshape(B, -1).astype(jnp.bfloat16)
        emb = params["emb"]

        if not train:
            feat, _ = _embed_multi(x_flat, emb["wf"][:1], emb["bf"][:1],
                                   emb["wh"][:1], emb["bh"][:1])
            return feat[0]                                    # feature_a

        assert B % 6 == 0, "Auto_Encoder_six needs a batch divisible by 6"
        feat, heads = _embed_multi(x_flat, emb["wf"], emb["bf"],
                                   emb["wh"], emb["bh"])
        feature_a, feature_p = feat[0], feat[1]
        output_a = heads[0, :, :nc]
        output_p = heads[1, :, :nc]
        mid_a = heads[0, :, ncpad:].reshape(B, c_mid, hm, wm)
        mid_p = heads[1, :, ncpad:].reshape(B, c_mid, hm, wm)

        p = B // 6
        fa = [feature_a[i * p:(i + 1) * p] for i in range(6)]
        fp = [feature_p[i * p:(i + 1) * p] for i in range(6)]
        ma = [mid_a[i * p:(i + 1) * p] for i in range(6)]
        mp = [mid_p[i * p:(i + 1) * p] for i in range(6)]

        # verify.classifier on the six squared-difference pairs (one fused call)
        pair_idx = ((0, 2), (1, 3), (0, 4), (1, 5), (2, 4), (3, 5))
        left = jnp.concatenate([fa[i] for i, _ in pair_idx], axis=0)
        right = jnp.concatenate([fa[j] for _, j in pair_idx], axis=0)
        results = _verify_classify(left, right,
                                   params["wc_pad"], params["bc_pad"])[:, :2]
        q = results.shape[0] // 3
        result1, result2, result3 = results[:q], results[q:2 * q], results[2 * q:]

        # 20 channel-concatenated (a, p) mid-coder combinations, torch order
        combos = ((0, 0), (1, 1), (2, 2), (3, 3), (4, 4), (5, 5),
                  (0, 1), (1, 0), (2, 3), (3, 2), (4, 5), (5, 4),
                  (0, 2), (1, 3), (2, 0), (3, 1), (0, 3), (1, 2), (2, 1), (3, 0))
        mid_all = jnp.concatenate(
            [jnp.concatenate([ma[i], mp[j]], axis=1) for i, j in combos], axis=0)

        rec_all = _decoder_forward(params["dec"], mid_all)
        r = rec_all.shape[0] // 20
        recs = tuple(rec_all[k * r:(k + 1) * r] for k in range(20))

        feats_out = (fa[0], fp[0], fa[1], fp[1], fa[2], fp[2],
                     fa[3], fp[3], fa[4], fp[4], fa[5], fp[5])
        return (output_a, output_p, result1, result2, result3) + feats_out + recs

    return forward


# -----------------------------------------------------------------------------
# Parameters
# -----------------------------------------------------------------------------
def init_params(key, cfg, in_dim=1024, feat_dim=512):
    nc = cfg["n_classes"]
    ncpad = cfg["nc_pad"]
    c_mid, hm, wm = cfg["c_mid"], cfg["hm"], cfg["wm"]
    mid_dim = c_mid * hm * wm
    dec_couts = cfg["dec_couts"]

    keys = iter(jax.random.split(key, 24))

    def dense(k, fan_in, shape, std=None):
        std = (2.0 / fan_in) ** 0.5 if std is None else std
        return jax.random.normal(k, shape, jnp.float32) * std

    # --- synthetic embedding nets a (idx 0) and p (idx 1) --------------------
    wf = jnp.stack([dense(next(keys), in_dim, (in_dim, feat_dim)) for _ in range(2)])
    bf = 0.1 * jax.random.normal(next(keys), (2, 1, feat_dim), jnp.float32)

    def heads_w(k1, k2):
        wo = dense(k1, feat_dim, (feat_dim, nc))
        wo = jnp.pad(wo, ((0, 0), (0, ncpad - nc)))           # lane-pad class head
        wmid = dense(k2, feat_dim, (feat_dim, mid_dim))
        return jnp.concatenate([wo, wmid], axis=1)            # (512, ncpad + mid_dim)

    wh = jnp.stack([heads_w(next(keys), next(keys)) for _ in range(2)])
    bh = 0.1 * jax.random.normal(next(keys), (2, 1, ncpad + mid_dim), jnp.float32)
    emb = dict(wf=wf.astype(jnp.bfloat16), bf=bf,
               wh=wh.astype(jnp.bfloat16), bh=bh)

    # --- verify = Fc_ClassBlock(1024, 2).classifier: Dropout + Linear(512, 2) -
    # weights_init_classifier: weight ~ N(0, 0.001), bias = 0 (Dropout == id, eval)
    wc = jax.random.normal(next(keys), (feat_dim, 2), jnp.float32) * 0.001
    wc_pad = jnp.pad(wc, ((0, 0), (0, ncpad - 2)))
    bc_pad = jnp.zeros((1, ncpad), jnp.float32)

    # --- decoder: ConvTranspose2d(k3,s2,p1,op1,no bias) + BN (+ LeakyReLU 0.1) -
    chans = (2 * c_mid,) + tuple(dec_couts)
    dec = []
    for li in range(len(dec_couts)):
        cin, cout = chans[li], chans[li + 1]
        # PyTorch ConvTranspose2d weight layout: (Cin, Cout, kh, kw)
        w = jax.random.normal(next(keys), (cin, cout, 3, 3), jnp.float32) \
            * (2.0 / (cin * 9)) ** 0.5
        gamma = 1.0 + 0.02 * jax.random.normal(next(keys), (cout,), jnp.float32)
        beta = jnp.zeros((cout,), jnp.float32)
        mean = jnp.zeros((cout,), jnp.float32)
        var = jnp.ones((cout,), jnp.float32)
        s = gamma / jnp.sqrt(var + 1e-5)
        t = beta - mean * s
        # fold the BN scale into the tap weights; tap index = kh*3+kw
        w9 = jnp.transpose(w * s[None, :, None, None], (2, 3, 0, 1)).reshape(9, cin, cout)
        dec.append(dict(w9=w9.astype(jnp.bfloat16),
                        shift=t.reshape(1, cout)))
    return dict(emb=emb, wc_pad=wc_pad, bc_pad=bc_pad, dec=dec)


def _close(a, b, tol):
    scale = jnp.maximum(jnp.max(jnp.abs(b)), 1e-3)
    return bool(jnp.max(jnp.abs(a - b)) <= tol * scale)


# -----------------------------------------------------------------------------
# Main
# -----------------------------------------------------------------------------
if __name__ == "__main__":
    cfg = dict(n_classes=8, nc_pad=128, c_mid=64, hm=2, wm=2,
               dec_couts=(512, 128, 64, 32, 3))
    key = jax.random.PRNGKey(0)
    kp, kx = jax.random.split(key)
    params = init_params(kp, cfg)
    forward = make_forward(cfg)

    B, C, H, W = 6, 4, 16, 16          # batch must be divisible by 6
    x = jax.random.normal(kx, (B, C, H, W), jnp.float32)

    # eval path: returns feature_a only
    feat_a = forward(params, x, train=False)
    jax.block_until_ready(feat_a)
    assert feat_a.shape == (B, 512)

    # train path: full 37-output tuple
    outs = forward(params, x, train=True)
    outs = jax.block_until_ready(outs)
    assert len(outs) == 37
    output_a, output_p, result1, result2, result3 = outs[:5]
    feat_slices = outs[5:17]
    recs = outs[17:]
    p = B // 6
    assert output_a.shape == (B, cfg["n_classes"])
    assert result1.shape == (2 * p, 2) and result3.shape == (2 * p, 2)
    assert all(f.shape == (p, 512) for f in feat_slices)
    assert all(r.shape == (p, 3, 64, 64) for r in recs)

    # --- correctness: embedding feature vs plain-JAX bf16 reference ----------
    feature_a = jnp.concatenate(feat_slices[0::2], axis=0)    # a-branch slices
    x_flat = x.reshape(B, -1).astype(jnp.bfloat16)
    ref_feat_a = (jnp.dot(x_flat, params["emb"]["wf"][0],
                          preferred_element_type=jnp.float32)
                  + params["emb"]["bf"][0])
    assert jnp.allclose(feature_a, ref_feat_a, atol=5e-2, rtol=5e-2), "embed mismatch"
    assert jnp.allclose(feat_a, feature_a, atol=1e-5, rtol=1e-5), "eval/train mismatch"

    # --- correctness: verify classifier vs plain-JAX reference ---------------
    fa = [feature_a[i * p:(i + 1) * p] for i in range(6)]
    wc = params["wc_pad"][:, :2]
    diffs = jnp.concatenate(
        [(fa[i] - fa[j]) ** 2 for i, j in
         ((0, 2), (1, 3), (0, 4), (1, 5), (2, 4), (3, 5))], axis=0)
    ref_results = jnp.dot(diffs, wc, precision=jax.lax.Precision.HIGHEST)
    assert jnp.allclose(result1, ref_results[:2 * p], atol=5e-3, rtol=5e-3)
    assert jnp.allclose(result2, ref_results[2 * p:4 * p], atol=5e-3, rtol=5e-3)
    assert jnp.allclose(result3, ref_results[4 * p:], atol=5e-3, rtol=5e-3)

    # --- correctness: one decoder layer vs true ConvTranspose2d semantics ----
    xt = jax.random.normal(jax.random.PRNGKey(1),
                           (4, 2 * cfg["c_mid"], 2, 2), jnp.float32)
    xt_nhwc = jnp.transpose(xt, (0, 2, 3, 1)).astype(jnp.bfloat16)
    lay0 = params["dec"][0]
    xp0 = jnp.pad(xt_nhwc, ((0, 0), (0, 1), (0, 1), (0, 0)))
    got0 = _interleave_phases(
        *_convt_layer(xp0, lay0["w9"], lay0["shift"], True)).astype(jnp.float32)
    ref0 = _convt_layer_ref(xt_nhwc, lay0["w9"], lay0["shift"], True)
    jax.block_until_ready(got0)
    assert _close(got0, ref0, 0.02), "ConvTranspose2d layer mismatch"

    # --- correctness: full 5-layer decoder vs composed dilated-conv reference -
    got_dec = _decoder_forward(params["dec"], xt)
    ref_dec = _decoder_ref(params["dec"], xt)
    jax.block_until_ready(got_dec)
    assert got_dec.shape == (4, 3, 64, 64)
    assert _close(got_dec, ref_dec, 0.05), "decoder mismatch"

    print("KERNEL_OK")
</pallas_src>

<mosaic_0001>
module attributes {stable_mosaic.version = 11 : i64} {
  func.func @_embed_kernel(%arg0: i32, %arg1: memref<6x1024xbf16, #tpu.memory_space<vmem>>, %arg2: memref<1x1024x512xbf16, #tpu.memory_space<vmem>>, %arg3: memref<1x1x512xf32, #tpu.memory_space<vmem>>, %arg4: memref<1x512x384xbf16, #tpu.memory_space<vmem>>, %arg5: memref<1x1x384xf32, #tpu.memory_space<vmem>>, %arg6: memref<1x6x512xf32, #tpu.memory_space<vmem>>, %arg7: memref<1x6x384xf32, #tpu.memory_space<vmem>>) attributes {dimension_semantics = [#tpu.dimension_semantics<parallel>], iteration_bounds = array<i64: 1>, scalar_prefetch = 0 : i64, scratch_operands = 0 : i64, tpu.core_type = #tpu.core_type<tc>, window_params = [{pipeline_mode = #tpu.pipeline_mode<synchronous>, transform_indices = @transform_0, window_bounds = array<i64: 6, 1024>}, {transform_indices = @transform_1, window_bounds = array<i64: 1, 1024, 512>}, {transform_indices = @transform_2, window_bounds = array<i64: 1, 1, 512>}, {transform_indices = @transform_3, window_bounds = array<i64: 1, 512, 384>}, {transform_indices = @transform_4, window_bounds = array<i64: 1, 1, 384>}, {transform_indices = @transform_5, window_bounds = array<i64: 1, 6, 512>}, {transform_indices = @transform_6, window_bounds = array<i64: 1, 6, 384>}]} {
    %c0 = arith.constant 0 : index
    %c0_0 = arith.constant 0 : index
    %0 = vector.load %arg1[%c0, %c0_0] : memref<6x1024xbf16, #tpu.memory_space<vmem>>, vector<6x1024xbf16>
    %c0_1 = arith.constant 0 : index
    %c0_2 = arith.constant 0 : index
    %c0_3 = arith.constant 0 : index
    %1 = vector.load %arg2[%c0_1, %c0_2, %c0_3] : memref<1x1024x512xbf16, #tpu.memory_space<vmem>>, vector<1x1024x512xbf16>
    %2 = vector.shape_cast %1 : vector<1x1024x512xbf16> to vector<1024x512xbf16>
    %cst = arith.constant dense<0.000000e+00> : vector<6x512xf32>
    %3 = tpu.matmul %0, %2, %cst {dimension_numbers = #tpu.dot_dimension_numbers<[1], [0], [0], [1], [0, 0, 1, 1], [], []>} : vector<6x1024xbf16>, vector<1024x512xbf16>, vector<6x512xf32> -> vector<6x512xf32>
    %c0_4 = arith.constant 0 : index
    %c0_5 = arith.constant 0 : index
    %c0_6 = arith.constant 0 : index
    %4 = vector.load %arg3[%c0_4, %c0_5, %c0_6] : memref<1x1x512xf32, #tpu.memory_space<vmem>>, vector<1x1x512xf32>
    %5 = vector.shape_cast %4 : vector<1x1x512xf32> to vector<1x512xf32>
    %6 = vector.broadcast %5 : vector<1x512xf32> to vector<6x512xf32>
    %7 = arith.addf %3, %6 : vector<6x512xf32>
    %c0_7 = arith.constant 0 : index
    %c0_8 = arith.constant 0 : index
    %c0_9 = arith.constant 0 : index
    %8 = vector.load %arg6[%c0_7, %c0_8, %c0_9] : memref<1x6x512xf32, #tpu.memory_space<vmem>>, vector<1x6x512xf32>
    %9 = vector.shape_cast %8 : vector<1x6x512xf32> to vector<6x512xf32>
    %10 = vector.shape_cast %7 : vector<6x512xf32> to vector<1x6x512xf32>
    tpu.vector_store %arg6[%c0_7, %c0_8, %c0_9], %10 {strides = array<i32>} : memref<1x6x512xf32, #tpu.memory_space<vmem>>, vector<1x6x512xf32>,
    %11 = arith.truncf %7 : vector<6x512xf32> to vector<6x512xbf16>
    %c0_10 = arith.constant 0 : index
    %c0_11 = arith.constant 0 : index
    %c0_12 = arith.constant 0 : index
    %12 = vector.load %arg4[%c0_10, %c0_11, %c0_12] : memref<1x512x384xbf16, #tpu.memory_space<vmem>>, vector<1x512x384xbf16>
    %13 = vector.shape_cast %12 : vector<1x512x384xbf16> to vector<512x384xbf16>
    %cst_13 = arith.constant dense<0.000000e+00> : vector<6x384xf32>
    %14 = tpu.matmul %11, %13, %cst_13 {dimension_numbers = #tpu.dot_dimension_numbers<[1], [0], [0], [1], [0, 0, 1, 1], [], []>} : vector<6x512xbf16>, vector<512x384xbf16>, vector<6x384xf32> -> vector<6x384xf32>
    %c0_14 = arith.constant 0 : index
    %c0_15 = arith.constant 0 : index
    %c0_16 = arith.constant 0 : index
    %15 = vector.load %arg5[%c0_14, %c0_15, %c0_16] : memref<1x1x384xf32, #tpu.memory_space<vmem>>, vector<1x1x384xf32>
    %16 = vector.shape_cast %15 : vector<1x1x384xf32> to vector<1x384xf32>
    %17 = vector.broadcast %16 : vector<1x384xf32> to vector<6x384xf32>
    %18 = arith.addf %14, %17 : vector<6x384xf32>
    %c0_17 = arith.constant 0 : index
    %c0_18 = arith.constant 0 : index
    %c0_19 = arith.constant 0 : index
    %19 = vector.load %arg7[%c0_17, %c0_18, %c0_19] : memref<1x6x384xf32, #tpu.memory_space<vmem>>, vector<1x6x384xf32>
    %20 = vector.shape_cast %19 : vector<1x6x384xf32> to vector<6x384xf32>
    %21 = vector.shape_cast %18 : vector<6x384xf32> to vector<1x6x384xf32>
    tpu.vector_store %arg7[%c0_17, %c0_18, %c0_19], %21 {strides = array<i32>} : memref<1x6x384xf32, #tpu.memory_space<vmem>>, vector<1x6x384xf32>,
    return
  }
  func.func @transform_0(%arg0: i32) -> (i32, i32) {
    %c0_i32 = arith.constant 0 : i32
    %c0_i32_0 = arith.constant 0 : i32
    %c0_i32_1 = arith.constant 0 : i32
    return %c0_i32, %c0_i32_0 : i32, i32
  }
  func.func @transform_1(%arg0: i32) -> (i32, i32, i32) {
    %c0_i32 = arith.constant 0 : i32
    %c0_i32_0 = arith.constant 0 : i32
    %c0_i32_1 = arith.constant 0 : i32
    return %arg0, %c0_i32, %c0_i32_0 : i32, i32, i32
  }
  func.func @transform_2(%arg0: i32) -> (i32, i32, i32) {
    %c0_i32 = arith.constant 0 : i32
    %c0_i32_0 = arith.constant 0 : i32
    %c0_i32_1 = arith.constant 0 : i32
    return %arg0, %c0_i32, %c0_i32_0 : i32, i32, i32
  }
  func.func @transform_3(%arg0: i32) -> (i32, i32, i32) {
    %c0_i32 = arith.constant 0 : i32
    %c0_i32_0 = arith.constant 0 : i32
    %c0_i32_1 = arith.constant 0 : i32
    return %arg0, %c0_i32, %c0_i32_0 : i32, i32, i32
  }
  func.func @transform_4(%arg0: i32) -> (i32, i32, i32) {
    %c0_i32 = arith.constant 0 : i32
    %c0_i32_0 = arith.constant 0 : i32
    %c0_i32_1 = arith.constant 0 : i32
    return %arg0, %c0_i32, %c0_i32_0 : i32, i32, i32
  }
  func.func @transform_5(%arg0: i32) -> (i32, i32, i32) {
    %c0_i32 = arith.constant 0 : i32
    %c0_i32_0 = arith.constant 0 : i32
    %c0_i32_1 = arith.constant 0 : i32
    return %arg0, %c0_i32, %c0_i32_0 : i32, i32, i32
  }
  func.func @transform_6(%arg0: i32) -> (i32, i32, i32) {
    %c0_i32 = arith.constant 0 : i32
    %c0_i32_0 = arith.constant 0 : i32
    %c0_i32_1 = arith.constant 0 : i32
    return %arg0, %c0_i32, %c0_i32_0 : i32, i32, i32
  }
}

</mosaic_0001>

<bundles_post_ra>
// kernel: forward.1
= control target key start
LH: loop header
LB: loop body
LE: loop exit
PB: predicated region body
PF: predicated region fallthrough
CT: control target
= control target key end

     0   :  { %12 = vsyncpa [#allocation3], 0  ;;  %s6956_s0 = inlined_call_operand.vmem [shape: bf16[6,1024], index: 0, kind: input, shape index: {}]   ;;  %s6957_s1 = inlined_call_operand.vmem [shape: bf16[1,1024,512], index: 1, kind: input, shape index: {}]   ;;  %s6958_s2 = inlined_call_operand.vmem [shape: f32[1,1,512], index: 2, kind: input, shape index: {}]   ;;  %s6959_s3 = inlined_call_operand.vmem [shape: bf16[1,512,384], index: 3, kind: input, shape index: {}]   ;;  %s6960_s4 = inlined_call_operand.vmem [shape: f32[1,1,384], index: 4, kind: input, shape index: {}]   ;;  %s6961_s5 = inlined_call_operand.hbm [shape: f32[1,6,512], index: 5, kind: output, shape index: {0}]   ;;  %s6962_s6 = inlined_call_operand.hbm [shape: f32[1,6,384], index: 6, kind: output, shape index: {1}]  }
   0x1   :  { %v2979_v0 = vld [vmem:[%s6957_s1 + $0xe0] sm:$0xf]  ;;  %v4303_v1 = vld [vmem:[%s6957_s1 + $0xec] sm:$0xf0] }
   0x2   :  { %v3107_v2 = vld [vmem:[%s6957_s1 + $0x1e0] sm:$0xf]  ;;  %v2980_v3 = vor.u32 %v4303_v1, %v2979_v0  ;;  %v4335_v4 = vld [vmem:[%s6957_s1 + $0x1ec] sm:$0xf0] }
   0x3   :  { %v3235_v5 = vld [vmem:[%s6957_s1 + $0x2e0] sm:$0xf]  ;;  %v4367_v6 = vld [vmem:[%s6957_s1 + $0x2ec] sm:$0xf0]  ;;  %v3108_v7 = vor.u32 %v4335_v4, %v3107_v2 }
   0x4   :  { %v3236_v8 = vor.u32 %v4367_v6, %v3235_v5  ;;  %v3363_v9 = vld [vmem:[%s6957_s1 + $0x3e0] sm:$0xf]  ;;  %v4399_v10 = vld [vmem:[%s6957_s1 + $0x3ec] sm:$0xf0]  ;;  %1602 = vmatpush.bf16.msra.mxu0 %v2980_v3 }
   0x5   :  { %v2963_v11 = vld [vmem:[%s6957_s1 + $0xc0] sm:$0xf]  ;;  %v3364_v12 = vor.u32 %v4399_v10, %v3363_v9  ;;  %v4299_v13 = vld [vmem:[%s6957_s1 + $0xcc] sm:$0xf0]  ;;  %1615 = vmatpush.bf16.msra.mxu1 %v3108_v7 }
   0x6   :  { %v3091_v14 = vld [vmem:[%s6957_s1 + $0x1c0] sm:$0xf]  ;;  %v4331_v15 = vld [vmem:[%s6957_s1 + $0x1cc] sm:$0xf0]  ;;  %1628 = vmatpush.bf16.msra.mxu2 %v3236_v8  ;;  %v2964_v16 = vor.u32 %v4299_v13, %v2963_v11 }
   0x7   :  { %v3092_v17 = vor.u32 %v4331_v15, %v3091_v14  ;;  %v3219_v18 = vld [vmem:[%s6957_s1 + $0x2c0] sm:$0xf]  ;;  %v4363_v19 = vld [vmem:[%s6957_s1 + $0x2cc] sm:$0xf0]  ;;  %1641 = vmatpush.bf16.msra.mxu3 %v3364_v12 }
   0x8   :  { %v3347_v20 = vld [vmem:[%s6957_s1 + $0x3c0] sm:$0xf]  ;;  %v3220_v21 = vor.u32 %v4363_v19, %v3219_v18  ;;  %v4395_v22 = vld [vmem:[%s6957_s1 + $0x3cc] sm:$0xf0]  ;;  %1603 = vmatpush.bf16.msra.mxu0 %v2964_v16 }
   0x9   :  { %v2947_v23 = vld [vmem:[%s6957_s1 + $0xa0] sm:$0xf]  ;;  %v4295_v24 = vld [vmem:[%s6957_s1 + $0xac] sm:$0xf0]  ;;  %v3348_v25 = vor.u32 %v4395_v22, %v3347_v20  ;;  %1616 = vmatpush.bf16.msra.mxu1 %v3092_v17 }
   0xa   :  { %v3075_v26 = vld [vmem:[%s6957_s1 + $0x1a0] sm:$0xf]  ;;  %v4327_v27 = vld [vmem:[%s6957_s1 + $0x1ac] sm:$0xf0]  ;;  %v2948_v29 = vor.u32 %v4295_v24, %v2947_v23  ;;  %1629 = vmatpush.bf16.msra.mxu2 %v3220_v21 }
   0xb   :  { %v3203_v28 = vld [vmem:[%s6957_s1 + $0x2a0] sm:$0xf]  ;;  %v4359_v30 = vld [vmem:[%s6957_s1 + $0x2ac] sm:$0xf0]  ;;  %v3076_v33 = vor.u32 %v4327_v27, %v3075_v26  ;;  %1642 = vmatpush.bf16.msra.mxu3 %v3348_v25 }
   0xc   :  { %v3331_v31 = vld [vmem:[%s6957_s1 + $0x3a0] sm:$0xf]  ;;  %v4391_v32 = vld [vmem:[%s6957_s1 + $0x3ac] sm:$0xf0]  ;;  %v3204_v34 = vor.u32 %v4359_v30, %v3203_v28  ;;  %1604 = vmatpush.bf16.msra.mxu0 %v2948_v29 }
   0xd   :  { %v2931_v35 = vld [vmem:[%s6957_s1 + $0x80] sm:$0xf]  ;;  %v4291_v36 = vld [vmem:[%s6957_s1 + $0x8c] sm:$0xf0]  ;;  %v3332_v38 = vor.u32 %v4391_v32, %v3331_v31  ;;  %1617 = vmatpush.bf16.msra.mxu1 %v3076_v33 }
   0xe   :  { %v3059_v37 = vld [vmem:[%s6957_s1 + $0x180] sm:$0xf]  ;;  %v4323_v39 = vld [vmem:[%s6957_s1 + $0x18c] sm:$0xf0]  ;;  %v2932_v44 = vor.u32 %v4291_v36, %v2931_v35  ;;  %1630 = vmatpush.bf16.msra.mxu2 %v3204_v34 }
   0xf   :  { %v3187_v40 = vld [vmem:[%s6957_s1 + $0x280] sm:$0xf]  ;;  %v4355_v41 = vld [vmem:[%s6957_s1 + $0x28c] sm:$0xf0]  ;;  %v3060_v45 = vor.u32 %v4323_v39, %v3059_v37  ;;  %1643 = vmatpush.bf16.msra.mxu3 %v3332_v38 }
  0x10   :  { %v3315_v42 = vld [vmem:[%s6957_s1 + $0x380] sm:$0xf]  ;;  %v4387_v43 = vld [vmem:[%s6957_s1 + $0x38c] sm:$0xf0]  ;;  %v3188_v46 = vor.u32 %v4355_v41, %v3187_v40  ;;  %1605 = vmatpush.bf16.msra.mxu0 %v2932_v44 }
  0x11   :  { %v2915_v47 = vld [vmem:[%s6957_s1 + $0x60] sm:$0xf]  ;;  %v4287_v48 = vld [vmem:[%s6957_s1 + $0x6c] sm:$0xf0]  ;;  %v3316_v50 = vor.u32 %v4387_v43, %v3315_v42  ;;  %1618 = vmatpush.bf16.msra.mxu1 %v3060_v45 }
  0x12   :  { %v3043_v49 = vld [vmem:[%s6957_s1 + $0x160] sm:$0xf]  ;;  %v4319_v51 = vld [vmem:[%s6957_s1 + $0x16c] sm:$0xf0]  ;;  %v2916_v56 = vor.u32 %v4287_v48, %v2915_v47  ;;  %1631 = vmatpush.bf16.msra.mxu2 %v3188_v46 }
  0x13   :  { %v3171_v52 = vld [vmem:[%s6957_s1 + $0x260] sm:$0xf]  ;;  %v4351_v53 = vld [vmem:[%s6957_s1 + $0x26c] sm:$0xf0]  ;;  %v3044_v57 = vor.u32 %v4319_v51, %v3043_v49  ;;  %1644 = vmatpush.bf16.msra.mxu3 %v3316_v50 }
  0x14   :  { %v3299_v54 = vld [vmem:[%s6957_s1 + $0x360] sm:$0xf]  ;;  %v4383_v55 = vld [vmem:[%s6957_s1 + $0x36c] sm:$0xf0]  ;;  %v3172_v58 = vor.u32 %v4351_v53, %v3171_v52  ;;  %1606 = vmatpush.bf16.msra.mxu0 %v2916_v56 }
  0x15   :  { %v2899_v59 = vld [vmem:[%s6957_s1 + $0x40] sm:$0xf]  ;;  %v4283_v60 = vld [vmem:[%s6957_s1 + $0x4c] sm:$0xf0]  ;;  %v3300_v62 = vor.u32 %v4383_v55, %v3299_v54  ;;  %1619 = vmatpush.bf16.msra.mxu1 %v3044_v57 }
  0x16   :  { %v3027_v61 = vld [vmem:[%s6957_s1 + $0x140] sm:$0xf]  ;;  %v4315_v63 = vld [vmem:[%s6957_s1 + $0x14c] sm:$0xf0]  ;;  %v2900_v4 = vor.u32 %v4283_v60, %v2899_v59  ;;  %1632 = vmatpush.bf16.msra.mxu2 %v3172_v58 }
  0x17   :  { %v3155_v0 = vld [vmem:[%s6957_s1 + $0x240] sm:$0xf]  ;;  %v4347_v1 = vld [vmem:[%s6957_s1 + $0x24c] sm:$0xf0]  ;;  %v3028_v5 = vor.u32 %v4315_v63, %v3027_v61  ;;  %1645 = vmatpush.bf16.msra.mxu3 %v3300_v62 }
  0x18   :  { %v3283_v2 = vld [vmem:[%s6957_s1 + $0x340] sm:$0xf]  ;;  %v4379_v3 = vld [vmem:[%s6957_s1 + $0x34c] sm:$0xf0]  ;;  %v3156_v6 = vor.u32 %v4347_v1, %v3155_v0  ;;  %1607 = vmatpush.bf16.msra.mxu0 %v2900_v4 }
  0x19   :  { %v2883_v7 = vld [vmem:[%s6957_s1 + $0x20] sm:$0xf]  ;;  %v4279_v8 = vld [vmem:[%s6957_s1 + $0x2c] sm:$0xf0]  ;;  %v3284_v10 = vor.u32 %v4379_v3, %v3283_v2  ;;  %1620 = vmatpush.bf16.msra.mxu1 %v3028_v5  ;;  %v25_v2 = vld [vmem:[%s6956_s0 + $0x8] sm:$0x77] }
  0x1a   :  { %v3011_v9 = vld [vmem:[%s6957_s1 + $0x120] sm:$0xf]  ;;  %v4311_v11 = vld [vmem:[%s6957_s1 + $0x12c] sm:$0xf0]  ;;  %v2884_v16 = vor.u32 %v4279_v8, %v2883_v7  ;;  %1633 = vmatpush.bf16.msra.mxu2 %v3156_v6  ;;  %v300_v8 = vunpack.c.l.b16 %v25_v2 }
  0x1b   :  { %v3139_v12 = vld [vmem:[%s6957_s1 + $0x220] sm:$0xf]  ;;  %v4343_v13 = vld [vmem:[%s6957_s1 + $0x22c] sm:$0xf0]  ;;  %v3012_v19 = vor.u32 %v4311_v11, %v3011_v9  ;;  %1646 = vmatpush.bf16.msra.mxu3 %v3284_v10  ;;  %v301_v10 = vunpack.c.h.b16 %v25_v2 }
  0x1c   :  { %v3267_v14 = vld [vmem:[%s6957_s1 + $0x320] sm:$0xf]  ;;  %v4375_v15 = vld [vmem:[%s6957_s1 + $0x32c] sm:$0xf0]  ;;  %v3140_v20 = vor.u32 %v4343_v13, %v3139_v12  ;;  %1608 = vmatpush.bf16.msra.mxu0 %v2884_v16 }
  0x1d   :  { %v2867_v17 = vld [vmem:[%s6957_s1] sm:$0xf]  ;;  %v4275_v18 = vld [vmem:[%s6957_s1 + $0xc] sm:$0xf0]  ;;  %v3268_v24 = vor.u32 %v4375_v15, %v3267_v14  ;;  %1621 = vmatpush.bf16.msra.mxu1 %v3012_v19 }
  0x1e   :  { %v2995_v21 = vld [vmem:[%s6957_s1 + $0x100] sm:$0xf]  ;;  %v4307_v22 = vld [vmem:[%s6957_s1 + $0x10c] sm:$0xf0]  ;;  %v2868_v31 = vor.u32 %v4275_v18, %v2867_v17  ;;  %1634 = vmatpush.bf16.msra.mxu2 %v3140_v20  ;;  %v5011_v18 = vpack.c.b16 %v300_v8, %v300_v8  ;;  %v5015_v20 = vpack.c.b16 %v301_v10, %v301_v10  ;;  %v4301_v8 = vld [vmem:[%s6957_s1 + $0xe4] sm:$0xf] }
  0x1f   :  { %v3123_v23 = vld [vmem:[%s6957_s1 + $0x200] sm:$0xf]  ;;  %v4339_v25 = vld [vmem:[%s6957_s1 + $0x20c] sm:$0xf0]  ;;  %v2996_v35 = vor.u32 %v4307_v22, %v2995_v21  ;;  %1647 = vmatpush.bf16.msra.mxu3 %v3268_v24  ;;  %v4333_v10 = vld [vmem:[%s6957_s1 + $0x1e4] sm:$0xf] }
  0x20   :  { %v3251_v26 = vld [vmem:[%s6957_s1 + $0x300] sm:$0xf]  ;;  %v4371_v27 = vld [vmem:[%s6957_s1 + $0x30c] sm:$0xf0]  ;;  %v3124_v36 = vor.u32 %v4339_v25, %v3123_v23  ;;  %1609 = vmatpush.bf16.msra.mxu0 %v2868_v31 }
  0x21   :  { %v3491_v28 = vld [vmem:[%s6957_s1 + $0x4e0] sm:$0xf]  ;;  %v4431_v29 = vld [vmem:[%s6957_s1 + $0x4ec] sm:$0xf0]  ;;  %v3252_v39 = vor.u32 %v4371_v27, %v3251_v26  ;;  %1622 = vmatpush.bf16.msra.mxu1 %v2996_v35 }
  0x22   :  { %v3619_v30 = vld [vmem:[%s6957_s1 + $0x5e0] sm:$0xf]  ;;  %v4463_v32 = vld [vmem:[%s6957_s1 + $0x5ec] sm:$0xf0]  ;;  %v3492_v40 = vor.u32 %v4431_v29, %v3491_v28  ;;  %1635 = vmatpush.bf16.msra.mxu2 %v3124_v36 }
  0x23   :  { %v3747_v33 = vld [vmem:[%s6957_s1 + $0x6e0] sm:$0xf]  ;;  %v4495_v34 = vld [vmem:[%s6957_s1 + $0x6ec] sm:$0xf0]  ;;  %v3620_v41 = vor.u32 %v4463_v32, %v3619_v30  ;;  %1648 = vmatpush.bf16.msra.mxu3 %v3252_v39 }
  0x24   :  { %v3875_v37 = vld [vmem:[%s6957_s1 + $0x7e0] sm:$0xf]  ;;  %v4527_v38 = vld [vmem:[%s6957_s1 + $0x7ec] sm:$0xf0]  ;;  %v3748_v42 = vor.u32 %v4495_v34, %v3747_v33  ;;  %1654 = vmatpush.bf16.msrb.mxu0 %v3492_v40 }
  0x25   :  { %v3475_v43 = vld [vmem:[%s6957_s1 + $0x4c0] sm:$0xf]  ;;  %v4427_v44 = vld [vmem:[%s6957_s1 + $0x4cc] sm:$0xf0]  ;;  %v3876_v46 = vor.u32 %v4527_v38, %v3875_v37  ;;  %1667 = vmatpush.bf16.msrb.mxu1 %v3620_v41  ;;  %1636 = vmatmul.bf16.vlgmr.msra.gmra.mxu2 %v5011_v18 }
  0x26   :  { %v3603_v45 = vld [vmem:[%s6957_s1 + $0x5c0] sm:$0xf]  ;;  %v4459_v47 = vld [vmem:[%s6957_s1 + $0x5cc] sm:$0xf0]  ;;  %v3476_v52 = vor.u32 %v4427_v44, %v3475_v43  ;;  %1680 = vmatpush.bf16.msrb.mxu2 %v3748_v42  ;;  %1649 = vmatmul.bf16.vlgmr.msra.gmra.mxu3 %v5015_v20 }
  0x27   :  { %v3731_v48 = vld [vmem:[%s6957_s1 + $0x6c0] sm:$0xf]  ;;  %v4491_v49 = vld [vmem:[%s6957_s1 + $0x6cc] sm:$0xf0]  ;;  %v3604_v54 = vor.u32 %v4459_v47, %v3603_v45  ;;  %1693 = vmatpush.bf16.msrb.mxu3 %v3876_v46 }
  0x28   :  { %v3859_v50 = vld [vmem:[%s6957_s1 + $0x7c0] sm:$0xf]  ;;  %v4523_v51 = vld [vmem:[%s6957_s1 + $0x7cc] sm:$0xf0]  ;;  %v3732_v55 = vor.u32 %v4491_v49, %v3731_v48  ;;  %1655 = vmatpush.bf16.msrb.mxu0 %v3476_v52 }
  0x29   :  { %v3459_v53 = vld [vmem:[%s6957_s1 + $0x4a0] sm:$0xf]  ;;  %v4423_v56 = vld [vmem:[%s6957_s1 + $0x4ac] sm:$0xf0]  ;;  %v3860_v59 = vor.u32 %v4523_v51, %v3859_v50  ;;  %1668 = vmatpush.bf16.msrb.mxu1 %v3604_v54 }
  0x2a   :  { %v3587_v57 = vld [vmem:[%s6957_s1 + $0x5a0] sm:$0xf]  ;;  %v4455_v58 = vld [vmem:[%s6957_s1 + $0x5ac] sm:$0xf0]  ;;  %v3460_v0 = vor.u32 %v4423_v56, %v3459_v53  ;;  %1681 = vmatpush.bf16.msrb.mxu2 %v3732_v55 }
  0x2b   :  { %v3715_v60 = vld [vmem:[%s6957_s1 + $0x6a0] sm:$0xf]  ;;  %v4487_v61 = vld [vmem:[%s6957_s1 + $0x6ac] sm:$0xf0]  ;;  %v3588_v1 = vor.u32 %v4455_v58, %v3587_v57  ;;  %1694 = vmatpush.bf16.msrb.mxu3 %v3860_v59 }
  0x2c   :  { %v3843_v62 = vld [vmem:[%s6957_s1 + $0x7a0] sm:$0xf]  ;;  %v4519_v63 = vld [vmem:[%s6957_s1 + $0x7ac] sm:$0xf0]  ;;  %v3716_v4 = vor.u32 %v4487_v61, %v3715_v60  ;;  %1656 = vmatpush.bf16.msrb.mxu0 %v3460_v0 }
  0x2d   :  { %v24_v3 = vld [vmem:[%s6956_s0] sm:$0x77]  ;;  %v4419_v6 = vld [vmem:[%s6957_s1 + $0x48c] sm:$0xf0]  ;;  %v3844_v11 = vor.u32 %v4519_v63, %v3843_v62  ;;  %1669 = vmatpush.bf16.msrb.mxu1 %v3588_v1 }
  0x2e   :  { %v3443_v5 = vld [vmem:[%s6957_s1 + $0x480] sm:$0xf]  ;;  %v298_v9 = vunpack.c.l.b16 %v24_v3  ;;  %v4451_v12 = vld [vmem:[%s6957_s1 + $0x58c] sm:$0xf0]  ;;  %v299_v15 = vunpack.c.h.b16 %v24_v3  ;;  %1682 = vmatpush.bf16.msrb.mxu2 %v3716_v4  ;;  %v27_v3 = vld [vmem:[%s6956_s0 + $0x18] sm:$0x77] }
  0x2f   :  { %v3571_v7 = vld [vmem:[%s6957_s1 + $0x580] sm:$0xf]  ;;  %v4483_v14 = vld [vmem:[%s6957_s1 + $0x68c] sm:$0xf0]  ;;  %v3444_v21 = vor.u32 %v4419_v6, %v3443_v5  ;;  %1695 = vmatpush.bf16.msrb.mxu3 %v3844_v11 }
  0x30   :  { %v3699_v13 = vld [vmem:[%s6957_s1 + $0x680] sm:$0xf]  ;;  %v4515_v17 = vld [vmem:[%s6957_s1 + $0x78c] sm:$0xf0]  ;;  %v5013_v19 = vpack.c.b16 %v298_v9, %v298_v9  ;;  %v5017_v22 = vpack.c.b16 %v299_v15, %v299_v15  ;;  %v3572_v23 = vor.u32 %v4451_v12, %v3571_v7  ;;  %v2981_v9 = vld [vmem:[%s6957_s1 + $0xf0] sm:$0xf0]  ;;  %v304_v15 = vunpack.c.l.b16 %v27_v3 }
  0x31   :  { %v3827_v16 = vld [vmem:[%s6957_s1 + $0x780] sm:$0xf]  ;;  %v3700_v24 = vor.u32 %v4483_v14, %v3699_v13  ;;  %v4415_v26 = vld [vmem:[%s6957_s1 + $0x46c] sm:$0xf0]  ;;  %1657 = vmatpush.bf16.msrb.mxu0 %v3444_v21  ;;  %v3109_v12 = vld [vmem:[%s6957_s1 + $0x1f0] sm:$0xf0] }
  0x32   :  { %v3427_v25 = vld [vmem:[%s6957_s1 + $0x460] sm:$0xf]  ;;  %v3828_v28 = vor.u32 %v4515_v17, %v3827_v16  ;;  %v4447_v29 = vld [vmem:[%s6957_s1 + $0x56c] sm:$0xf0]  ;;  %1610 = vmatmul.bf16.vlgmr.msra.gmra.mxu0 %v5013_v19  ;;  %1623 = vmatmul.bf16.vlgmr.msra.gmra.mxu1 %v5017_v22  ;;  %v4365_v13 = vld [vmem:[%s6957_s1 + $0x2e4] sm:$0xf] }
  0x33   :  { %v3555_v27 = vld [vmem:[%s6957_s1 + $0x560] sm:$0xf]  ;;  %v4479_v31 = vld [vmem:[%s6957_s1 + $0x66c] sm:$0xf0]  ;;  %v3428_v34 = vor.u32 %v4415_v26, %v3427_v25  ;;  %1670 = vmatpush.bf16.msrb.mxu1 %v3572_v23  ;;  %1683 = vmatpush.bf16.msrb.mxu2 %v3700_v24  ;;  %v3237_v14 = vld [vmem:[%s6957_s1 + $0x2f0] sm:$0xf0]  ;;  %v305_v25 = vunpack.c.h.b16 %v27_v3 }
  0x34   :  { %v3683_v30 = vld [vmem:[%s6957_s1 + $0x660] sm:$0xf]  ;;  %v4511_v33 = vld [vmem:[%s6957_s1 + $0x76c] sm:$0xf0]  ;;  %v3556_v35 = vor.u32 %v4447_v29, %v3555_v27  ;;  %1696 = vmatpush.bf16.msrb.mxu3 %v3828_v28  ;;  %v4397_v21 = vld [vmem:[%s6957_s1 + $0x3e4] sm:$0xf]  ;;  %v2984_v27 = vor.u32 %v4301_v8, %v2981_v9  ;;  %v3112_v29 = vor.u32 %v4333_v10, %v3109_v12 }
  0x35   :  { %v3811_v32 = vld [vmem:[%s6957_s1 + $0x760] sm:$0xf]  ;;  %v3684_v36 = vor.u32 %v4479_v31, %v3683_v30  ;;  %v4411_v38 = vld [vmem:[%s6957_s1 + $0x44c] sm:$0xf0]  ;;  %1658 = vmatpush.bf16.msrb.mxu0 %v3428_v34  ;;  %v3365_v23 = vld [vmem:[%s6957_s1 + $0x3f0] sm:$0xf0]  ;;  %v3240_v30 = vor.u32 %v4365_v13, %v3237_v14 }
  0x36   :  { %v3411_v37 = vld [vmem:[%s6957_s1 + $0x440] sm:$0xf]  ;;  %v3812_v40 = vor.u32 %v4511_v33, %v3811_v32  ;;  %v4443_v41 = vld [vmem:[%s6957_s1 + $0x54c] sm:$0xf0]  ;;  %v4297_v31 = vld [vmem:[%s6957_s1 + $0xc4] sm:$0xf]  ;;  %v3368_v34 = vor.u32 %v4397_v21, %v3365_v23 }
  0x37   :  { %v3539_v39 = vld [vmem:[%s6957_s1 + $0x540] sm:$0xf]  ;;  %v4475_v43 = vld [vmem:[%s6957_s1 + $0x64c] sm:$0xf0]  ;;  %v3412_v46 = vor.u32 %v4411_v38, %v3411_v37  ;;  %1671 = vmatpush.bf16.msrb.mxu1 %v3556_v35  ;;  %1684 = vmatpush.bf16.msrb.mxu2 %v3684_v36  ;;  %v2965_v32 = vld [vmem:[%s6957_s1 + $0xd0] sm:$0xf0]  ;;  %v5167_v38 = vpack.c.b16 %v304_v15, %v304_v15 }
  0x38   :  { %v3667_v42 = vld [vmem:[%s6957_s1 + $0x640] sm:$0xf]  ;;  %v4507_v45 = vld [vmem:[%s6957_s1 + $0x74c] sm:$0xf0]  ;;  %v3540_v47 = vor.u32 %v4443_v41, %v3539_v39  ;;  %1697 = vmatpush.bf16.msrb.mxu3 %v3812_v40  ;;  %v4329_v33 = vld [vmem:[%s6957_s1 + $0x1c4] sm:$0xf] }
  0x39   :  { %v3795_v44 = vld [vmem:[%s6957_s1 + $0x740] sm:$0xf]  ;;  %v3668_v48 = vor.u32 %v4475_v43, %v3667_v42  ;;  %v4407_v50 = vld [vmem:[%s6957_s1 + $0x42c] sm:$0xf0]  ;;  %1659 = vmatpush.bf16.msrb.mxu0 %v3412_v46  ;;  %v3093_v35 = vld [vmem:[%s6957_s1 + $0x1d0] sm:$0xf0]  ;;  %v5177_v42 = vpack.c.b16 %v305_v25, %v305_v25  ;;  %v2968_v43 = vor.u32 %v4297_v31, %v2965_v32 }
  0x3a   :  { %v3395_v49 = vld [vmem:[%s6957_s1 + $0x420] sm:$0xf]  ;;  %v3796_v52 = vor.u32 %v4507_v45, %v3795_v44  ;;  %v4439_v53 = vld [vmem:[%s6957_s1 + $0x52c] sm:$0xf0]  ;;  %v4361_v36 = vld [vmem:[%s6957_s1 + $0x2c4] sm:$0xf]  ;;  %v3096_v45 = vor.u32 %v4329_v33, %v3093_v35 }
  0x3b   :  { %v3523_v51 = vld [vmem:[%s6957_s1 + $0x520] sm:$0xf]  ;;  %v4471_v55 = vld [vmem:[%s6957_s1 + $0x62c] sm:$0xf0]  ;;  %v3396_v59 = vor.u32 %v4407_v50, %v3395_v49  ;;  %1672 = vmatpush.bf16.msrb.mxu1 %v3540_v47  ;;  %1685 = vmatpush.bf16.msrb.mxu2 %v3668_v48  ;;  %v3221_v37 = vld [vmem:[%s6957_s1 + $0x2d0] sm:$0xf0] }
  0x3c   :  { %v3651_v54 = vld [vmem:[%s6957_s1 + $0x620] sm:$0xf]  ;;  %v4503_v57 = vld [vmem:[%s6957_s1 + $0x72c] sm:$0xf0]  ;;  %v3524_v63 = vor.u32 %v4439_v53, %v3523_v51  ;;  %1698 = vmatpush.bf16.msrb.mxu3 %v3796_v52  ;;  %v4393_v39 = vld [vmem:[%s6957_s1 + $0x3c4] sm:$0xf]  ;;  %v3224_v46 = vor.u32 %v4361_v36, %v3221_v37 }
  0x3d   :  { %v3779_v56 = vld [vmem:[%s6957_s1 + $0x720] sm:$0xf]  ;;  %v4403_v60 = vld [vmem:[%s6957_s1 + $0x40c] sm:$0xf0]  ;;  %v3652_v0 = vor.u32 %v4471_v55, %v3651_v54  ;;  %1660 = vmatpush.bf16.msrb.mxu0 %v3396_v59  ;;  %v3349_v40 = vld [vmem:[%s6957_s1 + $0x3d0] sm:$0xf0] }
  0x3e   :  { %v3379_v58 = vld [vmem:[%s6957_s1 + $0x400] sm:$0xf]  ;;  %v4435_v62 = vld [vmem:[%s6957_s1 + $0x50c] sm:$0xf0]  ;;  %v3780_v4 = vor.u32 %v4503_v57, %v3779_v56  ;;  %v4293_v47 = vld [vmem:[%s6957_s1 + $0xa4] sm:$0xf]  ;;  %v3352_v50 = vor.u32 %v4393_v39, %v3349_v40 }
  0x3f   :  { %v3507_v61 = vld [vmem:[%s6957_s1 + $0x500] sm:$0xf]  ;;  %v4467_v2 = vld [vmem:[%s6957_s1 + $0x60c] sm:$0xf0]  ;;  %v3380_v11 = vor.u32 %v4403_v60, %v3379_v58  ;;  %1673 = vmatpush.bf16.msrb.mxu1 %v3524_v63  ;;  %1686 = vmatpush.bf16.msrb.mxu2 %v3652_v0  ;;  %v2949_v48 = vld [vmem:[%s6957_s1 + $0xb0] sm:$0xf0] }
  0x40   :  { %v3635_v1 = vld [vmem:[%s6957_s1 + $0x600] sm:$0xf]  ;;  %v4499_v6 = vld [vmem:[%s6957_s1 + $0x70c] sm:$0xf0]  ;;  %v3508_v16 = vor.u32 %v4435_v62, %v3507_v61  ;;  %1699 = vmatpush.bf16.msrb.mxu3 %v3780_v4  ;;  %v4325_v49 = vld [vmem:[%s6957_s1 + $0x1a4] sm:$0xf]  ;;  %v2952_v56 = vor.u32 %v4293_v47, %v2949_v48 }
  0x41   :  { %v3763_v5 = vld [vmem:[%s6957_s1 + $0x700] sm:$0xf]  ;;  %v26_v7 = vld [vmem:[%s6956_s0 + $0x10] sm:$0x77]  ;;  %v3636_v17 = vor.u32 %v4467_v2, %v3635_v1  ;;  %1661 = vmatpush.bf16.msrb.mxu0 %v3380_v11  ;;  %v4357_v52 = vld [vmem:[%s6957_s1 + $0x2a4] sm:$0xf] }
  0x42   :  { %v302_v24 = vunpack.c.l.b16 %v26_v7  ;;  %v3764_v26 = vor.u32 %v4499_v6, %v3763_v5  ;;  %v303_v28 = vunpack.c.h.b16 %v26_v7  ;;  %v3077_v51 = vld [vmem:[%s6957_s1 + $0x1b0] sm:$0xf0]  ;;  %v4389_v54 = vld [vmem:[%s6957_s1 + $0x3a4] sm:$0xf] }
  0x43   :  { %1674 = vmatpush.bf16.msrb.mxu1 %v3508_v16  ;;  %1687 = vmatpush.bf16.msrb.mxu2 %v3636_v17  ;;  %v3205_v53 = vld [vmem:[%s6957_s1 + $0x2b0] sm:$0xf0]  ;;  %v3080_v57 = vor.u32 %v4325_v49, %v3077_v51  ;;  %v4289_v59 = vld [vmem:[%s6957_s1 + $0x84] sm:$0xf] }
  0x44   :  { %v5175_v41 = vpack.c.b16 %v302_v24, %v302_v24  ;;  %1700 = vmatpush.bf16.msrb.mxu3 %v3764_v26  ;;  %v5179_v44 = vpack.c.b16 %v303_v28, %v303_v28  ;;  %v3333_v55 = vld [vmem:[%s6957_s1 + $0x3b0] sm:$0xf0]  ;;  %v3208_v58 = vor.u32 %v4357_v52, %v3205_v53  ;;  %v4321_v61 = vld [vmem:[%s6957_s1 + $0x184] sm:$0xf] }
  0x45   :  { %1706 = vmatpush.bf16.msra.mxu0 %v2984_v27  ;;  %v2933_v60 = vld [vmem:[%s6957_s1 + $0x90] sm:$0xf0]  ;;  %v3336_v62 = vor.u32 %v4389_v54, %v3333_v55  ;;  %v4353_v0 = vld [vmem:[%s6957_s1 + $0x284] sm:$0xf] }
  0x46   :  { %1688 = vmatmul.bf16.vlgmr.msrb.gmra.mxu2 %v5167_v38  ;;  %1662 = vmatmul.bf16.vlgmr.msrb.gmra.mxu0 %v5175_v41  ;;  %v3061_v63 = vld [vmem:[%s6957_s1 + $0x190] sm:$0xf0]  ;;  %v4385_v2 = vld [vmem:[%s6957_s1 + $0x384] sm:$0xf]  ;;  %v2936_v4 = vor.u32 %v4289_v59, %v2933_v60 }
  0x47   :  { %1719 = vmatpush.bf16.msra.mxu1 %v3112_v29  ;;  %1732 = vmatpush.bf16.msra.mxu2 %v3240_v30  ;;  %v3189_v1 = vld [vmem:[%s6957_s1 + $0x290] sm:$0xf0]  ;;  %v3064_v5 = vor.u32 %v4321_v61, %v3061_v63  ;;  %v4285_v7 = vld [vmem:[%s6957_s1 + $0x64] sm:$0xf] }
  0x48   :  { %1745 = vmatpush.bf16.msra.mxu3 %v3368_v34  ;;  %1675 = vmatmul.bf16.vlgmr.msrb.gmra.mxu1 %v5179_v44  ;;  %v3317_v3 = vld [vmem:[%s6957_s1 + $0x390] sm:$0xf0]  ;;  %v3192_v6 = vor.u32 %v4353_v0, %v3189_v1  ;;  %v4317_v9 = vld [vmem:[%s6957_s1 + $0x164] sm:$0xf] }
  0x49   :  { %1701 = vmatmul.bf16.vlgmr.msrb.gmra.mxu3 %v5177_v42  ;;  %1707 = vmatpush.bf16.msra.mxu0 %v2968_v43  ;;  %v2917_v8 = vld [vmem:[%s6957_s1 + $0x70] sm:$0xf0]  ;;  %v3320_v10 = vor.u32 %v4385_v2, %v3317_v3  ;;  %v4349_v12 = vld [vmem:[%s6957_s1 + $0x264] sm:$0xf] }
  0x4a   :  { %v3045_v11 = vld [vmem:[%s6957_s1 + $0x170] sm:$0xf0]  ;;  %v4381_v14 = vld [vmem:[%s6957_s1 + $0x364] sm:$0xf]  ;;  %v2920_v16 = vor.u32 %v4285_v7, %v2917_v8 }
  0x4b   :  { %1720 = vmatpush.bf16.msra.mxu1 %v3096_v45  ;;  %1733 = vmatpush.bf16.msra.mxu2 %v3224_v46  ;;  %v3173_v13 = vld [vmem:[%s6957_s1 + $0x270] sm:$0xf0]  ;;  %v3048_v17 = vor.u32 %v4317_v9, %v3045_v11  ;;  %v4281_v23 = vld [vmem:[%s6957_s1 + $0x44] sm:$0xf] }
  0x4c   :  { %1746 = vmatpush.bf16.msra.mxu3 %v3352_v50  ;;  %v3301_v15 = vld [vmem:[%s6957_s1 + $0x370] sm:$0xf0]  ;;  %v3176_v21 = vor.u32 %v4349_v12, %v3173_v13  ;;  %v4313_v25 = vld [vmem:[%s6957_s1 + $0x144] sm:$0xf] }
  0x4d   :  { %1708 = vmatpush.bf16.msra.mxu0 %v2952_v56  ;;  %v2901_v24 = vld [vmem:[%s6957_s1 + $0x50] sm:$0xf0]  ;;  %v3304_v26 = vor.u32 %v4381_v14, %v3301_v15  ;;  %v4345_v28 = vld [vmem:[%s6957_s1 + $0x244] sm:$0xf] }
  0x4e   :  { %v3029_v27 = vld [vmem:[%s6957_s1 + $0x150] sm:$0xf0]  ;;  %v4377_v30 = vld [vmem:[%s6957_s1 + $0x344] sm:$0xf] }
  0x4f   :  { %1721 = vmatpush.bf16.msra.mxu1 %v3080_v57  ;;  %1734 = vmatpush.bf16.msra.mxu2 %v3208_v58  ;;  %v3157_v29 = vld [vmem:[%s6957_s1 + $0x250] sm:$0xf0] }
  0x50   :  { %1747 = vmatpush.bf16.msra.mxu3 %v3336_v62  ;;  %v3285_v31 = vld [vmem:[%s6957_s1 + $0x350] sm:$0xf0] }
  0x51   :  { %1709 = vmatpush.bf16.msra.mxu0 %v2936_v4 }
  0x53   :  { %1722 = vmatpush.bf16.msra.mxu1 %v3064_v5  ;;  %1735 = vmatpush.bf16.msra.mxu2 %v3192_v6 }
  0x54   :  { %1748 = vmatpush.bf16.msra.mxu3 %v3320_v10 }
  0x55   :  { %13 = vsyncpa [#allocation5], 0  ;;  %1710 = vmatpush.bf16.msra.mxu0 %v2920_v16  ;;  %v2904_v32 = vor.u32 %v4281_v23, %v2901_v24  ;;  %v3032_v33 = vor.u32 %v4313_v25, %v3029_v27  ;;  %v3160_v34 = vor.u32 %v4345_v28, %v3157_v29  ;;  %v4277_v35 = vld [vmem:[%s6957_s1 + $0x24] sm:$0xf]  ;;  %v2885_v36 = vld [vmem:[%s6957_s1 + $0x30] sm:$0xf0]  ;;  %v3288_v39 = vor.u32 %v4377_v30, %v3285_v31 }
  0x56   :  { %v4309_v37 = vld [vmem:[%s6957_s1 + $0x124] sm:$0xf]  ;;  %v3013_v40 = vld [vmem:[%s6957_s1 + $0x130] sm:$0xf0]  ;;  %v2888_v48 = vor.u32 %v4277_v35, %v2885_v36  ;;  %s4680_s0 = smov [#allocation2]   ;;  %s2840_s9 = sshll.u32 %s6961_s5, 4  ;;  %s2841_s9 = int_to_ptr.hbm [resolvable:$true] %s2840_s9 }
  0x57   :  { %1723 = vmatpush.bf16.msra.mxu1 %v3048_v17  ;;  %1736 = vmatpush.bf16.msra.mxu2 %v3176_v21  ;;  %v4341_v43 = vld [vmem:[%s6957_s1 + $0x224] sm:$0xf]  ;;  %v3141_v45 = vld [vmem:[%s6957_s1 + $0x230] sm:$0xf0]  ;;  %v3016_v51 = vor.u32 %v4309_v37, %v3013_v40  ;;  %s2838_s30 = sshll.u32 %s4680_s0, 4  ;;  %s2851_s12 = sshll.u32 %s6962_s6, 4  ;;  %s2839_s30 = int_to_ptr.vmem [resolvable:$true] %s2838_s30  ;;  %s2852_s12 = int_to_ptr.hbm [resolvable:$true] %s2851_s12 }
  0x58   :  { %1749 = vmatpush.bf16.msra.mxu3 %v3304_v26  ;;  %v4373_v46 = vld [vmem:[%s6957_s1 + $0x324] sm:$0xf]  ;;  %v3269_v47 = vld [vmem:[%s6957_s1 + $0x330] sm:$0xf0]  ;;  %v3144_v52 = vor.u32 %v4341_v43, %v3141_v45 }
  0x59   :  { %1711 = vmatpush.bf16.msra.mxu0 %v2904_v32  ;;  %v4273_v49 = vld [vmem:[%s6957_s1 + $0x4] sm:$0xf]  ;;  %v2869_v50 = vld [vmem:[%s6957_s1 + $0x10] sm:$0xf0]  ;;  %v3272_v56 = vor.u32 %v4373_v46, %v3269_v47 }
  0x5a   :  { %v4305_v53 = vld [vmem:[%s6957_s1 + $0x104] sm:$0xf]  ;;  %v2997_v54 = vld [vmem:[%s6957_s1 + $0x110] sm:$0xf0]  ;;  %v2872_v63 = vor.u32 %v4273_v49, %v2869_v50 }
  0x5b   :  { %1724 = vmatpush.bf16.msra.mxu1 %v3032_v33  ;;  %1737 = vmatpush.bf16.msra.mxu2 %v3160_v34  ;;  %v4337_v55 = vld [vmem:[%s6957_s1 + $0x204] sm:$0xf]  ;;  %v3125_v57 = vld [vmem:[%s6957_s1 + $0x210] sm:$0xf0]  ;;  %v3000_v3 = vor.u32 %v4305_v53, %v2997_v54 }
  0x5c   :  { %1750 = vmatpush.bf16.msra.mxu3 %v3288_v39  ;;  %v4369_v58 = vld [vmem:[%s6957_s1 + $0x304] sm:$0xf]  ;;  %v3253_v59 = vld [vmem:[%s6957_s1 + $0x310] sm:$0xf0]  ;;  %v3128_v4 = vor.u32 %v4337_v55, %v3125_v57 }
  0x5d   :  { %v4429_v60 = vld [vmem:[%s6957_s1 + $0x4e4] sm:$0xf]  ;;  %v3493_v61 = vld [vmem:[%s6957_s1 + $0x4f0] sm:$0xf0]  ;;  %1712 = vmatpush.bf16.msra.mxu0 %v2888_v48  ;;  %v3256_v7 = vor.u32 %v4369_v58, %v3253_v59 }
  0x5e   :  { %v4461_v62 = vld [vmem:[%s6957_s1 + $0x5e4] sm:$0xf]  ;;  %v3621_v0 = vld [vmem:[%s6957_s1 + $0x5f0] sm:$0xf0]  ;;  %v3496_v8 = vor.u32 %v4429_v60, %v3493_v61 }
  0x5f   :  { %v4493_v1 = vld [vmem:[%s6957_s1 + $0x6e4] sm:$0xf]  ;;  %v3749_v2 = vld [vmem:[%s6957_s1 + $0x6f0] sm:$0xf0]  ;;  %1725 = vmatpush.bf16.msra.mxu1 %v3016_v51  ;;  %1738 = vmatpush.bf16.msra.mxu2 %v3144_v52  ;;  %v3624_v9 = vor.u32 %v4461_v62, %v3621_v0 }
  0x60   :  { %v4525_v5 = vld [vmem:[%s6957_s1 + $0x7e4] sm:$0xf]  ;;  %v3877_v6 = vld [vmem:[%s6957_s1 + $0x7f0] sm:$0xf0]  ;;  %1751 = vmatpush.bf16.msra.mxu3 %v3272_v56  ;;  %v3752_v10 = vor.u32 %v4493_v1, %v3749_v2 }
  0x61   :  { %v4425_v11 = vld [vmem:[%s6957_s1 + $0x4c4] sm:$0xf]  ;;  %v3477_v12 = vld [vmem:[%s6957_s1 + $0x4d0] sm:$0xf0]  ;;  %1713 = vmatpush.bf16.msra.mxu0 %v2872_v63  ;;  %v3880_v14 = vor.u32 %v4525_v5, %v3877_v6 }
  0x62   :  { %v4457_v13 = vld [vmem:[%s6957_s1 + $0x5c4] sm:$0xf]  ;;  %v3605_v15 = vld [vmem:[%s6957_s1 + $0x5d0] sm:$0xf0]  ;;  %v3480_v24 = vor.u32 %v4425_v11, %v3477_v12 }
  0x63   :  { %v4489_v16 = vld [vmem:[%s6957_s1 + $0x6c4] sm:$0xf]  ;;  %v3733_v17 = vld [vmem:[%s6957_s1 + $0x6d0] sm:$0xf0]  ;;  %1726 = vmatpush.bf16.msra.mxu1 %v3000_v3  ;;  %1739 = vmatpush.bf16.msra.mxu2 %v3128_v4  ;;  %v3608_v25 = vor.u32 %v4457_v13, %v3605_v15 }
  0x64   :  { %v4521_v21 = vld [vmem:[%s6957_s1 + $0x7c4] sm:$0xf]  ;;  %v3861_v23 = vld [vmem:[%s6957_s1 + $0x7d0] sm:$0xf0]  ;;  %1752 = vmatpush.bf16.msra.mxu3 %v3256_v7  ;;  %v3736_v26 = vor.u32 %v4489_v16, %v3733_v17  ;;  %1714 = vmatmul.bf16.vlgmr.msra.gmra.mxu0 %v5013_v19 }
  0x65   :  { %1758 = vmatpush.bf16.msrb.mxu0 %v3496_v8  ;;  %v4421_v27 = vld [vmem:[%s6957_s1 + $0x4a4] sm:$0xf]  ;;  %v3461_v28 = vld [vmem:[%s6957_s1 + $0x4b0] sm:$0xf0]  ;;  %v3864_v30 = vor.u32 %v4521_v21, %v3861_v23 }
  0x66   :  { %v4453_v29 = vld [vmem:[%s6957_s1 + $0x5a4] sm:$0xf]  ;;  %v3589_v31 = vld [vmem:[%s6957_s1 + $0x5b0] sm:$0xf0]  ;;  %1740 = vmatmul.bf16.vlgmr.msra.gmra.mxu2 %v5011_v18  ;;  %v3464_v36 = vor.u32 %v4421_v27, %v3461_v28  ;;  %1727 = vmatmul.bf16.vlgmr.msra.gmra.mxu1 %v5017_v22 }
  0x67   :  { %1771 = vmatpush.bf16.msrb.mxu1 %v3624_v9  ;;  %1784 = vmatpush.bf16.msrb.mxu2 %v3752_v10  ;;  %v4485_v32 = vld [vmem:[%s6957_s1 + $0x6a4] sm:$0xf]  ;;  %v3717_v33 = vld [vmem:[%s6957_s1 + $0x6b0] sm:$0xf0]  ;;  %v3592_v37 = vor.u32 %v4453_v29, %v3589_v31 }
  0x68   :  { %1797 = vmatpush.bf16.msrb.mxu3 %v3880_v14  ;;  %v4517_v34 = vld [vmem:[%s6957_s1 + $0x7a4] sm:$0xf]  ;;  %v3845_v35 = vld [vmem:[%s6957_s1 + $0x7b0] sm:$0xf0]  ;;  %v3720_v39 = vor.u32 %v4485_v32, %v3717_v33 }
  0x69   :  { %1753 = vmatmul.bf16.vlgmr.msra.gmra.mxu3 %v5015_v20  ;;  %1759 = vmatpush.bf16.msrb.mxu0 %v3480_v24  ;;  %v4417_v40 = vld [vmem:[%s6957_s1 + $0x484] sm:$0xf]  ;;  %v3445_v43 = vld [vmem:[%s6957_s1 + $0x490] sm:$0xf0]  ;;  %v3848_v46 = vor.u32 %v4517_v34, %v3845_v35 }
  0x6a   :  { %v4449_v45 = vld [vmem:[%s6957_s1 + $0x584] sm:$0xf]  ;;  %v3573_v47 = vld [vmem:[%s6957_s1 + $0x590] sm:$0xf0]  ;;  %v3448_v52 = vor.u32 %v4417_v40, %v3445_v43  ;;  %v2987_v43 = vld [vmem:[%s6957_s1 + $0xe8] sm:$0xf] }
  0x6b   :  { %1772 = vmatpush.bf16.msrb.mxu1 %v3608_v25  ;;  %1785 = vmatpush.bf16.msrb.mxu2 %v3736_v26  ;;  %v4481_v48 = vld [vmem:[%s6957_s1 + $0x684] sm:$0xf]  ;;  %v3701_v49 = vld [vmem:[%s6957_s1 + $0x690] sm:$0xf0]  ;;  %v3576_v53 = vor.u32 %v4449_v45, %v3573_v47  ;;  %v4304_v45 = vld [vmem:[%s6957_s1 + $0xf4] sm:$0xf0] }
  0x6c   :  { %1798 = vmatpush.bf16.msrb.mxu3 %v3864_v30  ;;  %v4513_v50 = vld [vmem:[%s6957_s1 + $0x784] sm:$0xf]  ;;  %v3829_v51 = vld [vmem:[%s6957_s1 + $0x790] sm:$0xf0]  ;;  %v3704_v54 = vor.u32 %v4481_v48, %v3701_v49  ;;  %v4336_v48 = vld [vmem:[%s6957_s1 + $0x1f4] sm:$0xf0] }
  0x6d   :  { %1760 = vmatpush.bf16.msrb.mxu0 %v3464_v36  ;;  %v4413_v55 = vld [vmem:[%s6957_s1 + $0x464] sm:$0xf]  ;;  %v3429_v56 = vld [vmem:[%s6957_s1 + $0x470] sm:$0xf0]  ;;  %v3832_v58 = vor.u32 %v4513_v50, %v3829_v51  ;;  %v3243_v49 = vld [vmem:[%s6957_s1 + $0x2e8] sm:$0xf] }
  0x6e   :  { %v4445_v57 = vld [vmem:[%s6957_s1 + $0x564] sm:$0xf]  ;;  %v3557_v59 = vld [vmem:[%s6957_s1 + $0x570] sm:$0xf0]  ;;  %v3432_v0 = vor.u32 %v4413_v55, %v3429_v56  ;;  %v4368_v50 = vld [vmem:[%s6957_s1 + $0x2f4] sm:$0xf0]  ;;  %v2988_v56 = vor.u32 %v4304_v45, %v2987_v43 }
  0x6f   :  { %1773 = vmatpush.bf16.msrb.mxu1 %v3592_v37  ;;  %1786 = vmatpush.bf16.msrb.mxu2 %v3720_v39  ;;  %v4477_v60 = vld [vmem:[%s6957_s1 + $0x664] sm:$0xf]  ;;  %v3685_v61 = vld [vmem:[%s6957_s1 + $0x670] sm:$0xf0]  ;;  %v3560_v1 = vor.u32 %v4445_v57, %v3557_v59  ;;  %v2971_v59 = vld [vmem:[%s6957_s1 + $0xc8] sm:$0xf] }
  0x70   :  { %1799 = vmatpush.bf16.msrb.mxu3 %v3848_v46  ;;  %v4509_v62 = vld [vmem:[%s6957_s1 + $0x764] sm:$0xf]  ;;  %v3813_v63 = vld [vmem:[%s6957_s1 + $0x770] sm:$0xf0]  ;;  %v3688_v2 = vor.u32 %v4477_v60, %v3685_v61  ;;  %v3115_v46 = vld [vmem:[%s6957_s1 + $0x1e8] sm:$0xf] }
  0x71   :  { %1761 = vmatpush.bf16.msrb.mxu0 %v3448_v52  ;;  %v4409_v3 = vld [vmem:[%s6957_s1 + $0x444] sm:$0xf]  ;;  %v3413_v4 = vld [vmem:[%s6957_s1 + $0x450] sm:$0xf0]  ;;  %v3816_v6 = vor.u32 %v4509_v62, %v3813_v63  ;;  %v3116_v57 = vor.u32 %v4336_v48, %v3115_v46  ;;  %v4300_v60 = vld [vmem:[%s6957_s1 + $0xd4] sm:$0xf0] }
  0x72   :  { %v4441_v5 = vld [vmem:[%s6957_s1 + $0x544] sm:$0xf]  ;;  %v3541_v7 = vld [vmem:[%s6957_s1 + $0x550] sm:$0xf0]  ;;  %v3416_v12 = vor.u32 %v4409_v3, %v3413_v4  ;;  %v3099_v61 = vld [vmem:[%s6957_s1 + $0x1c8] sm:$0xf]  ;;  %v2972_v4 = vor.u32 %v4300_v60, %v2971_v59 }
  0x73   :  { %1774 = vmatpush.bf16.msrb.mxu1 %v3576_v53  ;;  %1787 = vmatpush.bf16.msrb.mxu2 %v3704_v54  ;;  %v4473_v8 = vld [vmem:[%s6957_s1 + $0x644] sm:$0xf]  ;;  %v3669_v9 = vld [vmem:[%s6957_s1 + $0x650] sm:$0xf0]  ;;  %v3544_v13 = vor.u32 %v4441_v5, %v3541_v7  ;;  %v3371_v53 = vld [vmem:[%s6957_s1 + $0x3e8] sm:$0xf] }
  0x74   :  { %1800 = vmatpush.bf16.msrb.mxu3 %v3832_v58  ;;  %v4505_v10 = vld [vmem:[%s6957_s1 + $0x744] sm:$0xf]  ;;  %v3797_v11 = vld [vmem:[%s6957_s1 + $0x750] sm:$0xf0]  ;;  %v3672_v14 = vor.u32 %v4473_v8, %v3669_v9  ;;  %v4400_v54 = vld [vmem:[%s6957_s1 + $0x3f4] sm:$0xf0]  ;;  %v3244_v58 = vor.u32 %v4368_v50, %v3243_v49 }
  0x75   :  { %1762 = vmatpush.bf16.msrb.mxu0 %v3432_v0  ;;  %v4405_v15 = vld [vmem:[%s6957_s1 + $0x424] sm:$0xf]  ;;  %v3397_v16 = vld [vmem:[%s6957_s1 + $0x430] sm:$0xf0]  ;;  %v3800_v21 = vor.u32 %v4505_v10, %v3797_v11  ;;  %v3372_v62 = vor.u32 %v4400_v54, %v3371_v53  ;;  %v4332_v63 = vld [vmem:[%s6957_s1 + $0x1d4] sm:$0xf0] }
  0x76   :  { %v4437_v17 = vld [vmem:[%s6957_s1 + $0x524] sm:$0xf]  ;;  %v3525_v23 = vld [vmem:[%s6957_s1 + $0x530] sm:$0xf0]  ;;  %v3400_v28 = vor.u32 %v4405_v15, %v3397_v16  ;;  %v3227_v0 = vld [vmem:[%s6957_s1 + $0x2c8] sm:$0xf]  ;;  %v3100_v5 = vor.u32 %v4332_v63, %v3099_v61 }
  0x77   :  { %1775 = vmatpush.bf16.msrb.mxu1 %v3560_v1  ;;  %1788 = vmatpush.bf16.msrb.mxu2 %v3688_v2  ;;  %v4469_v24 = vld [vmem:[%s6957_s1 + $0x624] sm:$0xf]  ;;  %v3653_v25 = vld [vmem:[%s6957_s1 + $0x630] sm:$0xf0]  ;;  %v3528_v31 = vor.u32 %v4437_v17, %v3525_v23  ;;  %v4364_v1 = vld [vmem:[%s6957_s1 + $0x2d4] sm:$0xf0] }
  0x78   :  { %1801 = vmatpush.bf16.msrb.mxu3 %v3816_v6  ;;  %v4501_v26 = vld [vmem:[%s6957_s1 + $0x724] sm:$0xf]  ;;  %v3781_v27 = vld [vmem:[%s6957_s1 + $0x730] sm:$0xf0]  ;;  %v3656_v32 = vor.u32 %v4469_v24, %v3653_v25  ;;  %v3355_v2 = vld [vmem:[%s6957_s1 + $0x3c8] sm:$0xf]  ;;  %v3228_v6 = vor.u32 %v4364_v1, %v3227_v0 }
  0x79   :  { %1763 = vmatpush.bf16.msrb.mxu0 %v3416_v12  ;;  %v4401_v29 = vld [vmem:[%s6957_s1 + $0x404] sm:$0xf]  ;;  %v3381_v30 = vld [vmem:[%s6957_s1 + $0x410] sm:$0xf0]  ;;  %v3784_v36 = vor.u32 %v4501_v26, %v3781_v27  ;;  %v4396_v3 = vld [vmem:[%s6957_s1 + $0x3d4] sm:$0xf0] }
  0x7a   :  { %v4433_v33 = vld [vmem:[%s6957_s1 + $0x504] sm:$0xf]  ;;  %v3509_v34 = vld [vmem:[%s6957_s1 + $0x510] sm:$0xf0]  ;;  %v3384_v47 = vor.u32 %v4401_v29, %v3381_v30  ;;  %v2955_v7 = vld [vmem:[%s6957_s1 + $0xa8] sm:$0xf]  ;;  %v3356_v10 = vor.u32 %v4396_v3, %v3355_v2 }
  0x7b   :  { %1776 = vmatpush.bf16.msrb.mxu1 %v3544_v13  ;;  %1789 = vmatpush.bf16.msrb.mxu2 %v3672_v14  ;;  %v4465_v35 = vld [vmem:[%s6957_s1 + $0x604] sm:$0xf]  ;;  %v3637_v37 = vld [vmem:[%s6957_s1 + $0x610] sm:$0xf0]  ;;  %v3512_v51 = vor.u32 %v4433_v33, %v3509_v34  ;;  %v4296_v8 = vld [vmem:[%s6957_s1 + $0xb4] sm:$0xf0] }
  0x7c   :  { %1802 = vmatpush.bf16.msrb.mxu3 %v3800_v21  ;;  %v4497_v39 = vld [vmem:[%s6957_s1 + $0x704] sm:$0xf]  ;;  %v3765_v40 = vld [vmem:[%s6957_s1 + $0x710] sm:$0xf0]  ;;  %v3640_v52 = vor.u32 %v4465_v35, %v3637_v37  ;;  %v3083_v9 = vld [vmem:[%s6957_s1 + $0x1a8] sm:$0xf]  ;;  %v2956_v16 = vor.u32 %v4296_v8, %v2955_v7 }
  0x7d   :  { %1764 = vmatpush.bf16.msrb.mxu0 %v3400_v28  ;;  %v3768_v55 = vor.u32 %v4497_v39, %v3765_v40  ;;  %v4328_v11 = vld [vmem:[%s6957_s1 + $0x1b4] sm:$0xf0]  ;;  %v3211_v12 = vld [vmem:[%s6957_s1 + $0x2a8] sm:$0xf] }
  0x7e   :  { %v4360_v13 = vld [vmem:[%s6957_s1 + $0x2b4] sm:$0xf0]  ;;  %v3339_v14 = vld [vmem:[%s6957_s1 + $0x3a8] sm:$0xf]  ;;  %v3084_v17 = vor.u32 %v4328_v11, %v3083_v9 }
  0x7f   :  { %1777 = vmatpush.bf16.msrb.mxu1 %v3528_v31  ;;  %1790 = vmatpush.bf16.msrb.mxu2 %v3656_v32  ;;  %v4392_v15 = vld [vmem:[%s6957_s1 + $0x3b4] sm:$0xf0]  ;;  %v3212_v21 = vor.u32 %v4360_v13, %v3211_v12  ;;  %v2939_v23 = vld [vmem:[%s6957_s1 + $0x88] sm:$0xf] }
  0x80   :  { %1803 = vmatpush.bf16.msrb.mxu3 %v3784_v36  ;;  %v4292_v24 = vld [vmem:[%s6957_s1 + $0x94] sm:$0xf0]  ;;  %v3067_v25 = vld [vmem:[%s6957_s1 + $0x188] sm:$0xf]  ;;  %v3340_v26 = vor.u32 %v4392_v15, %v3339_v14 }
  0x81   :  { %1765 = vmatpush.bf16.msrb.mxu0 %v3384_v47  ;;  %v4324_v27 = vld [vmem:[%s6957_s1 + $0x194] sm:$0xf0]  ;;  %v3195_v28 = vld [vmem:[%s6957_s1 + $0x288] sm:$0xf]  ;;  %v2940_v32 = vor.u32 %v4292_v24, %v2939_v23 }
  0x82   :  { %v4356_v29 = vld [vmem:[%s6957_s1 + $0x294] sm:$0xf0]  ;;  %v3323_v30 = vld [vmem:[%s6957_s1 + $0x388] sm:$0xf]  ;;  %v3068_v33 = vor.u32 %v4324_v27, %v3067_v25 }
  0x83   :  { %1778 = vmatpush.bf16.msrb.mxu1 %v3512_v51  ;;  %1791 = vmatpush.bf16.msrb.mxu2 %v3640_v52  ;;  %v4388_v31 = vld [vmem:[%s6957_s1 + $0x394] sm:$0xf0]  ;;  %v3196_v34 = vor.u32 %v4356_v29, %v3195_v28  ;;  %v2923_v35 = vld [vmem:[%s6957_s1 + $0x68] sm:$0xf] }
  0x84   :  { %1804 = vmatpush.bf16.msrb.mxu3 %v3768_v55  ;;  %1766 = vmatmul.bf16.vlgmr.msrb.gmra.mxu0 %v5175_v41  ;;  %v4288_v36 = vld [vmem:[%s6957_s1 + $0x74] sm:$0xf0]  ;;  %v3051_v37 = vld [vmem:[%s6957_s1 + $0x168] sm:$0xf]  ;;  %v3324_v39 = vor.u32 %v4388_v31, %v3323_v30 }
  0x85   :  { %1810 = vmatpush.bf16.msra.mxu0 %v2988_v56  ;;  %v4320_v40 = vld [vmem:[%s6957_s1 + $0x174] sm:$0xf0]  ;;  %v3179_v43 = vld [vmem:[%s6957_s1 + $0x268] sm:$0xf]  ;;  %v2924_v48 = vor.u32 %v4288_v36, %v2923_v35 }
  0x86   :  { %1792 = vmatmul.bf16.vlgmr.msrb.gmra.mxu2 %v5167_v38  ;;  %1779 = vmatmul.bf16.vlgmr.msrb.gmra.mxu1 %v5179_v44  ;;  %v4352_v45 = vld [vmem:[%s6957_s1 + $0x274] sm:$0xf0]  ;;  %v3307_v46 = vld [vmem:[%s6957_s1 + $0x368] sm:$0xf]  ;;  %v3052_v49 = vor.u32 %v4320_v40, %v3051_v37 }
  0x87   :  { %1823 = vmatpush.bf16.msra.mxu1 %v3116_v57  ;;  %1836 = vmatpush.bf16.msra.mxu2 %v3244_v58  ;;  %v4384_v47 = vld [vmem:[%s6957_s1 + $0x374] sm:$0xf0]  ;;  %v3180_v50 = vor.u32 %v4352_v45, %v3179_v43  ;;  %v2907_v51 = vld [vmem:[%s6957_s1 + $0x48] sm:$0xf] }
  0x88   :  { %1849 = vmatpush.bf16.msra.mxu3 %v3372_v62  ;;  %v4284_v52 = vld [vmem:[%s6957_s1 + $0x54] sm:$0xf0]  ;;  %v3035_v53 = vld [vmem:[%s6957_s1 + $0x148] sm:$0xf]  ;;  %v3308_v54 = vor.u32 %v4384_v47, %v3307_v46 }
  0x89   :  { %1805 = vmatmul.bf16.vlgmr.msrb.gmra.mxu3 %v5177_v42  ;;  %1811 = vmatpush.bf16.msra.mxu0 %v2972_v4  ;;  %v4316_v55 = vld [vmem:[%s6957_s1 + $0x154] sm:$0xf0]  ;;  %v3163_v56 = vld [vmem:[%s6957_s1 + $0x248] sm:$0xf]  ;;  %v2908_v60 = vor.u32 %v4284_v52, %v2907_v51 }
  0x8a   :  { %v4348_v57 = vld [vmem:[%s6957_s1 + $0x254] sm:$0xf0]  ;;  %v3291_v58 = vld [vmem:[%s6957_s1 + $0x348] sm:$0xf]  ;;  %v3036_v61 = vor.u32 %v4316_v55, %v3035_v53 }
  0x8b   :  { %1824 = vmatpush.bf16.msra.mxu1 %v3100_v5  ;;  %1837 = vmatpush.bf16.msra.mxu2 %v3228_v6  ;;  %v4380_v59 = vld [vmem:[%s6957_s1 + $0x354] sm:$0xf0]  ;;  %v3164_v62 = vor.u32 %v4348_v57, %v3163_v56  ;;  %v2891_v63 = vld [vmem:[%s6957_s1 + $0x28] sm:$0xf] }
  0x8c   :  { %1850 = vmatpush.bf16.msra.mxu3 %v3356_v10  ;;  %v4280_v0 = vld [vmem:[%s6957_s1 + $0x34] sm:$0xf0]  ;;  %v3019_v1 = vld [vmem:[%s6957_s1 + $0x128] sm:$0xf]  ;;  %v3292_v2 = vor.u32 %v4380_v59, %v3291_v58 }
  0x8d   :  { %1812 = vmatpush.bf16.msra.mxu0 %v2956_v16  ;;  %v4312_v3 = vld [vmem:[%s6957_s1 + $0x134] sm:$0xf0]  ;;  %v3147_v4 = vld [vmem:[%s6957_s1 + $0x228] sm:$0xf]  ;;  %v2892_v8 = vor.u32 %v4280_v0, %v2891_v63 }
  0x8e   :  { %v4344_v5 = vld [vmem:[%s6957_s1 + $0x234] sm:$0xf0]  ;;  %v3275_v6 = vld [vmem:[%s6957_s1 + $0x328] sm:$0xf]  ;;  %v3020_v11 = vor.u32 %v4312_v3, %v3019_v1 }
  0x8f   :  { %1825 = vmatpush.bf16.msra.mxu1 %v3084_v17  ;;  %1838 = vmatpush.bf16.msra.mxu2 %v3212_v21  ;;  %v4376_v7 = vld [vmem:[%s6957_s1 + $0x334] sm:$0xf0]  ;;  %v2875_v9 = vld [vmem:[%s6957_s1 + $0x8] sm:$0xf]  ;;  %v3148_v12 = vor.u32 %v4344_v5, %v3147_v4 }
  0x90   :  { %1851 = vmatpush.bf16.msra.mxu3 %v3340_v26  ;;  %v4276_v10 = vld [vmem:[%s6957_s1 + $0x14] sm:$0xf0]  ;;  %v3003_v13 = vld [vmem:[%s6957_s1 + $0x108] sm:$0xf]  ;;  %v3276_v16 = vor.u32 %v4376_v7, %v3275_v6 }
  0x91   :  { %1813 = vmatpush.bf16.msra.mxu0 %v2940_v32  ;;  %v4308_v14 = vld [vmem:[%s6957_s1 + $0x114] sm:$0xf0]  ;;  %v3131_v15 = vld [vmem:[%s6957_s1 + $0x208] sm:$0xf]  ;;  %v2876_v27 = vor.u32 %v4276_v10, %v2875_v9 }
  0x92   :  { %v4340_v17 = vld [vmem:[%s6957_s1 + $0x214] sm:$0xf0]  ;;  %v3259_v21 = vld [vmem:[%s6957_s1 + $0x308] sm:$0xf]  ;;  %v3004_v31 = vor.u32 %v4308_v14, %v3003_v13 }
  0x93   :  { %1826 = vmatpush.bf16.msra.mxu1 %v3068_v33  ;;  %1839 = vmatpush.bf16.msra.mxu2 %v3196_v34  ;;  %v4372_v23 = vld [vmem:[%s6957_s1 + $0x314] sm:$0xf0]  ;;  %v3499_v24 = vld [vmem:[%s6957_s1 + $0x4e8] sm:$0xf]  ;;  %v3132_v32 = vor.u32 %v4340_v17, %v3131_v15 }
  0x94   :  { %1852 = vmatpush.bf16.msra.mxu3 %v3324_v39  ;;  %v4432_v25 = vld [vmem:[%s6957_s1 + $0x4f4] sm:$0xf0]  ;;  %v3627_v26 = vld [vmem:[%s6957_s1 + $0x5e8] sm:$0xf]  ;;  %v3260_v35 = vor.u32 %v4372_v23, %v3259_v21 }
  0x95   :  { %1814 = vmatpush.bf16.msra.mxu0 %v2924_v48  ;;  %v4464_v28 = vld [vmem:[%s6957_s1 + $0x5f4] sm:$0xf0]  ;;  %v3755_v29 = vld [vmem:[%s6957_s1 + $0x6e8] sm:$0xf]  ;;  %v3500_v36 = vor.u32 %v4432_v25, %v3499_v24 }
  0x96   :  { %v4496_v30 = vld [vmem:[%s6957_s1 + $0x6f4] sm:$0xf0]  ;;  %v3883_v33 = vld [vmem:[%s6957_s1 + $0x7e8] sm:$0xf]  ;;  %v3628_v37 = vor.u32 %v4464_v28, %v3627_v26 }
  0x97   :  { %1827 = vmatpush.bf16.msra.mxu1 %v3052_v49  ;;  %1840 = vmatpush.bf16.msra.mxu2 %v3180_v50  ;;  %v4528_v34 = vld [vmem:[%s6957_s1 + $0x7f4] sm:$0xf0]  ;;  %v3756_v39 = vor.u32 %v4496_v30, %v3755_v29  ;;  %v3483_v40 = vld [vmem:[%s6957_s1 + $0x4c8] sm:$0xf] }
  0x98   :  { %1853 = vmatpush.bf16.msra.mxu3 %v3308_v54  ;;  %v4428_v43 = vld [vmem:[%s6957_s1 + $0x4d4] sm:$0xf0]  ;;  %v3611_v45 = vld [vmem:[%s6957_s1 + $0x5c8] sm:$0xf]  ;;  %v3884_v46 = vor.u32 %v4528_v34, %v3883_v33 }
  0x99   :  { %1815 = vmatpush.bf16.msra.mxu0 %v2908_v60  ;;  %v4460_v47 = vld [vmem:[%s6957_s1 + $0x5d4] sm:$0xf0]  ;;  %v3739_v48 = vld [vmem:[%s6957_s1 + $0x6c8] sm:$0xf]  ;;  %v3484_v52 = vor.u32 %v4428_v43, %v3483_v40 }
  0x9a   :  { %v4492_v49 = vld [vmem:[%s6957_s1 + $0x6d4] sm:$0xf0]  ;;  %v3867_v50 = vld [vmem:[%s6957_s1 + $0x7c8] sm:$0xf]  ;;  %v3612_v53 = vor.u32 %v4460_v47, %v3611_v45  ;;  %v5872_v45 = vld [vmem:[%s6958_s2] sm:$0xf] }
  0x9b   :  { %1828 = vmatpush.bf16.msra.mxu1 %v3036_v61  ;;  %1841 = vmatpush.bf16.msra.mxu2 %v3164_v62  ;;  %v4524_v51 = vld [vmem:[%s6957_s1 + $0x7d4] sm:$0xf0]  ;;  %v3740_v54 = vor.u32 %v4492_v49, %v3739_v48  ;;  %v3467_v55 = vld [vmem:[%s6957_s1 + $0x4a8] sm:$0xf] }
  0x9c   :  { %1854 = vmatpush.bf16.msra.mxu3 %v3292_v2  ;;  %v4424_v56 = vld [vmem:[%s6957_s1 + $0x4b4] sm:$0xf0]  ;;  %v3595_v57 = vld [vmem:[%s6957_s1 + $0x5a8] sm:$0xf]  ;;  %v3868_v58 = vor.u32 %v4524_v51, %v3867_v50 }
  0x9d   :  { %1816 = vmatpush.bf16.msra.mxu0 %v2892_v8  ;;  %v4456_v59 = vld [vmem:[%s6957_s1 + $0x5b4] sm:$0xf0]  ;;  %v3723_v60 = vld [vmem:[%s6957_s1 + $0x6a8] sm:$0xf]  ;;  %v3468_v0 = vor.u32 %v4424_v56, %v3467_v55 }
  0x9e   :  { %v4488_v61 = vld [vmem:[%s6957_s1 + $0x6b4] sm:$0xf0]  ;;  %v3851_v62 = vld [vmem:[%s6957_s1 + $0x7a8] sm:$0xf]  ;;  %v3596_v1 = vor.u32 %v4456_v59, %v3595_v57  ;;  %v286_v59 = vperm.slane %v5872_v45, 0 }
  0x9f   :  { %1829 = vmatpush.bf16.msra.mxu1 %v3020_v11  ;;  %1842 = vmatpush.bf16.msra.mxu2 %v3148_v12  ;;  %v4520_v63 = vld [vmem:[%s6957_s1 + $0x7b4] sm:$0xf0]  ;;  %v3724_v2 = vor.u32 %v4488_v61, %v3723_v60  ;;  %v3451_v3 = vld [vmem:[%s6957_s1 + $0x488] sm:$0xf] }
  0xa0   :  { %1855 = vmatpush.bf16.msra.mxu3 %v3276_v16  ;;  %v4420_v4 = vld [vmem:[%s6957_s1 + $0x494] sm:$0xf0]  ;;  %v3579_v5 = vld [vmem:[%s6957_s1 + $0x588] sm:$0xf]  ;;  %v3852_v6 = vor.u32 %v4520_v63, %v3851_v62 }
  0xa1   :  { %1817 = vmatpush.bf16.msra.mxu0 %v2876_v27  ;;  %v4452_v7 = vld [vmem:[%s6957_s1 + $0x594] sm:$0xf0]  ;;  %v3707_v8 = vld [vmem:[%s6957_s1 + $0x688] sm:$0xf]  ;;  %v3452_v12 = vor.u32 %v4420_v4, %v3451_v3 }
  0xa2   :  { %v4484_v9 = vld [vmem:[%s6957_s1 + $0x694] sm:$0xf0]  ;;  %v3835_v10 = vld [vmem:[%s6957_s1 + $0x788] sm:$0xf]  ;;  %v3580_v13 = vor.u32 %v4452_v7, %v3579_v5 }
  0xa3   :  { %1830 = vmatpush.bf16.msra.mxu1 %v3004_v31  ;;  %1843 = vmatpush.bf16.msra.mxu2 %v3132_v32  ;;  %v4516_v11 = vld [vmem:[%s6957_s1 + $0x794] sm:$0xf0]  ;;  %v3708_v14 = vor.u32 %v4484_v9, %v3707_v8  ;;  %v3435_v15 = vld [vmem:[%s6957_s1 + $0x468] sm:$0xf] }
  0xa4   :  { %1856 = vmatpush.bf16.msra.mxu3 %v3260_v35  ;;  %1818 = vmatmul.bf16.vlgmr.msra.gmra.mxu0 %v5013_v19  ;;  %v4416_v16 = vld [vmem:[%s6957_s1 + $0x474] sm:$0xf0]  ;;  %v3563_v17 = vld [vmem:[%s6957_s1 + $0x568] sm:$0xf]  ;;  %v3836_v21 = vor.u32 %v4516_v11, %v3835_v10  ;;  %v4302_v10 = vld [vmem:[%s6957_s1 + $0xec] sm:$0xf] }
  0xa5   :  { %1862 = vmatpush.bf16.msrb.mxu0 %v3500_v36  ;;  %v4448_v23 = vld [vmem:[%s6957_s1 + $0x574] sm:$0xf0]  ;;  %v3691_v24 = vld [vmem:[%s6957_s1 + $0x668] sm:$0xf]  ;;  %v3436_v28 = vor.u32 %v4416_v16, %v3435_v15  ;;  %v2989_v11 = vld [vmem:[%s6957_s1 + $0xf8] sm:$0xf0] }
  0xa6   :  { %1844 = vmatmul.bf16.vlgmr.msra.gmra.mxu2 %v5011_v18  ;;  %1831 = vmatmul.bf16.vlgmr.msra.gmra.mxu1 %v5017_v22  ;;  %v4480_v25 = vld [vmem:[%s6957_s1 + $0x674] sm:$0xf0]  ;;  %v3819_v26 = vld [vmem:[%s6957_s1 + $0x768] sm:$0xf]  ;;  %v3564_v29 = vor.u32 %v4448_v23, %v3563_v17  ;;  %v3117_v15 = vld [vmem:[%s6957_s1 + $0x1f8] sm:$0xf0] }
  0xa7   :  { %1875 = vmatpush.bf16.msrb.mxu1 %v3628_v37  ;;  %1888 = vmatpush.bf16.msrb.mxu2 %v3756_v39  ;;  %v4512_v27 = vld [vmem:[%s6957_s1 + $0x774] sm:$0xf0]  ;;  %v3692_v30 = vor.u32 %v4480_v25, %v3691_v24  ;;  %v3419_v31 = vld [vmem:[%s6957_s1 + $0x448] sm:$0xf]  ;;  %v4366_v16 = vld [vmem:[%s6957_s1 + $0x2ec] sm:$0xf] }
  0xa8   :  { %1901 = vmatpush.bf16.msrb.mxu3 %v3884_v46  ;;  %v4412_v32 = vld [vmem:[%s6957_s1 + $0x454] sm:$0xf0]  ;;  %v3547_v33 = vld [vmem:[%s6957_s1 + $0x548] sm:$0xf]  ;;  %v3820_v34 = vor.u32 %v4512_v27, %v3819_v26  ;;  %v1637_v4 = vpop.f32.mrf.mxu2  ;;  %v3245_v17 = vld [vmem:[%s6957_s1 + $0x2f8] sm:$0xf0] }
  0xa9   :  { %1857 = vmatmul.bf16.vlgmr.msra.gmra.mxu3 %v5015_v20  ;;  %1863 = vmatpush.bf16.msrb.mxu0 %v3484_v52  ;;  %v4444_v35 = vld [vmem:[%s6957_s1 + $0x554] sm:$0xf0]  ;;  %v3675_v36 = vld [vmem:[%s6957_s1 + $0x648] sm:$0xf]  ;;  %v3420_v43 = vor.u32 %v4412_v32, %v3419_v31  ;;  %v5923_v9 = vpop.f32.mrf.mxu3  ;;  %v4398_v25 = vld [vmem:[%s6957_s1 + $0x3ec] sm:$0xf]  ;;  %v3248_v31 = vor.u32 %v4366_v16, %v3245_v17 }
  0xaa   :  { %v4476_v37 = vld [vmem:[%s6957_s1 + $0x654] sm:$0xf0]  ;;  %v3803_v39 = vld [vmem:[%s6957_s1 + $0x748] sm:$0xf]  ;;  %v3548_v47 = vor.u32 %v4444_v35, %v3547_v33  ;;  %v3373_v26 = vld [vmem:[%s6957_s1 + $0x3f8] sm:$0xf0] }
  0xab   :  { %1876 = vmatpush.bf16.msrb.mxu1 %v3612_v53  ;;  %1889 = vmatpush.bf16.msrb.mxu2 %v3740_v54  ;;  %v4508_v40 = vld [vmem:[%s6957_s1 + $0x754] sm:$0xf0]  ;;  %v3676_v48 = vor.u32 %v4476_v37, %v3675_v36  ;;  %v3403_v49 = vld [vmem:[%s6957_s1 + $0x428] sm:$0xf]  ;;  %v4298_v32 = vld [vmem:[%s6957_s1 + $0xcc] sm:$0xf]  ;;  %v3376_v36 = vor.u32 %v4398_v25, %v3373_v26 }
  0xac   :  { %1902 = vmatpush.bf16.msrb.mxu3 %v3868_v58  ;;  %v4408_v50 = vld [vmem:[%s6957_s1 + $0x434] sm:$0xf0]  ;;  %v3531_v51 = vld [vmem:[%s6957_s1 + $0x528] sm:$0xf]  ;;  %v3804_v53 = vor.u32 %v4508_v40, %v3803_v39  ;;  %v2973_v33 = vld [vmem:[%s6957_s1 + $0xd8] sm:$0xf0] }
  0xad   :  { %1864 = vmatpush.bf16.msrb.mxu0 %v3468_v0  ;;  %v4440_v54 = vld [vmem:[%s6957_s1 + $0x534] sm:$0xf0]  ;;  %v3659_v55 = vld [vmem:[%s6957_s1 + $0x628] sm:$0xf]  ;;  %v3404_v60 = vor.u32 %v4408_v50, %v3403_v49  ;;  %v3101_v37 = vld [vmem:[%s6957_s1 + $0x1d8] sm:$0xf0] }
  0xae   :  { %v4472_v56 = vld [vmem:[%s6957_s1 + $0x634] sm:$0xf0]  ;;  %v3787_v57 = vld [vmem:[%s6957_s1 + $0x728] sm:$0xf]  ;;  %v3532_v63 = vor.u32 %v4440_v54, %v3531_v51  ;;  %v4362_v39 = vld [vmem:[%s6957_s1 + $0x2cc] sm:$0xf] }
  0xaf   :  { %1877 = vmatpush.bf16.msrb.mxu1 %v3596_v1  ;;  %1890 = vmatpush.bf16.msrb.mxu2 %v3724_v2  ;;  %v1611_v46 = vpop.f32.mrf.mxu0  ;;  %v1624_v52 = vpop.f32.mrf.mxu1  ;;  %v4504_v58 = vld [vmem:[%s6957_s1 + $0x734] sm:$0xf0]  ;;  %v3387_v61 = vld [vmem:[%s6957_s1 + $0x408] sm:$0xf]  ;;  %v3660_v0 = vor.u32 %v4472_v56, %v3659_v55  ;;  %v3229_v40 = vld [vmem:[%s6957_s1 + $0x2d8] sm:$0xf0] }
  0xb0   :  { %1903 = vmatpush.bf16.msrb.mxu3 %v3852_v6  ;;  %v4404_v62 = vld [vmem:[%s6957_s1 + $0x414] sm:$0xf0]  ;;  %v3515_v1 = vld [vmem:[%s6957_s1 + $0x508] sm:$0xf]  ;;  %v3788_v5 = vor.u32 %v4504_v58, %v3787_v57  ;;  %v3232_v51 = vor.u32 %v4362_v39, %v3229_v40  ;;  %v2957_v54 = vld [vmem:[%s6957_s1 + $0xb8] sm:$0xf0] }
  0xb1   :  { %1865 = vmatpush.bf16.msrb.mxu0 %v3452_v12  ;;  %v4436_v2 = vld [vmem:[%s6957_s1 + $0x514] sm:$0xf0]  ;;  %v3643_v3 = vld [vmem:[%s6957_s1 + $0x608] sm:$0xf]  ;;  %v4334_v12 = vld [vmem:[%s6957_s1 + $0x1ec] sm:$0xf]  ;;  %v1652_v49 = vpop.f32.mrf.mxu3 }
  0xb2   :  { %v4468_v6 = vld [vmem:[%s6957_s1 + $0x614] sm:$0xf0]  ;;  %v3771_v7 = vld [vmem:[%s6957_s1 + $0x708] sm:$0xf]  ;;  %v3516_v23 = vor.u32 %v4436_v2, %v3515_v1  ;;  %v4326_v55 = vld [vmem:[%s6957_s1 + $0x1ac] sm:$0xf] }
  0xb3   :  { %1878 = vmatpush.bf16.msrb.mxu1 %v3580_v13  ;;  %1891 = vmatpush.bf16.msrb.mxu2 %v3708_v14  ;;  %v4500_v8 = vld [vmem:[%s6957_s1 + $0x714] sm:$0xf0]  ;;  %v1612_v13 = vadd.f32 %v1611_v46, %v286_v59  ;;  %v3388_v14 = vor.u32 %v4404_v62, %v3387_v61  ;;  %v3644_v24 = vor.u32 %v4468_v6, %v3643_v3  ;;  %v3357_v46 = vld [vmem:[%s6957_s1 + $0x3d8] sm:$0xf0]  ;;  %v4358_v58 = vld [vmem:[%s6957_s1 + $0x2ac] sm:$0xf] }
  0xb4   :  { %1904 = vmatpush.bf16.msrb.mxu3 %v3836_v21  ;;  %v3085_v57 = vld [vmem:[%s6957_s1 + $0x1b8] sm:$0xf0]  ;;  %v4290_v2 = vld [vmem:[%s6957_s1 + $0x8c] sm:$0xf] }
  0xb5   :  { %1866 = vmatpush.bf16.msrb.mxu0 %v3436_v28  ;;  %v3772_v28 = vor.u32 %v4500_v8, %v3771_v7  ;;  %v1625_v35 = vadd.f32 %v1624_v52, %v1612_v13  ;;  %v3213_v59 = vld [vmem:[%s6957_s1 + $0x2b8] sm:$0xf0]  ;;  %v4354_v7 = vld [vmem:[%s6957_s1 + $0x28c] sm:$0xf] }
  0xb6   :  { %v3341_v61 = vld [vmem:[%s6957_s1 + $0x3b8] sm:$0xf0]  ;;  %v4318_v17 = vld [vmem:[%s6957_s1 + $0x16c] sm:$0xf] }
  0xb7   :  { %1879 = vmatpush.bf16.msrb.mxu1 %v3564_v29  ;;  %1892 = vmatpush.bf16.msrb.mxu2 %v3692_v30  ;;  %v1613_v21 = vpop.f32.mrf.mxu0  ;;  %v1626_v27 = vpop.f32.mrf.mxu1  ;;  %v2992_v29 = vor.u32 %v4302_v10, %v2989_v11  ;;  %v3120_v30 = vor.u32 %v4334_v12, %v3117_v15  ;;  %v1638_v52 = vadd.f32 %v1637_v4, %v1625_v35  ;;  %v2941_v3 = vld [vmem:[%s6957_s1 + $0x98] sm:$0xf0]  ;;  %v4322_v4 = vld [vmem:[%s6957_s1 + $0x18c] sm:$0xf] }
  0xb8   :  { %1905 = vmatpush.bf16.msrb.mxu3 %v3820_v34  ;;  %v4330_v34 = vld [vmem:[%s6957_s1 + $0x1cc] sm:$0xf]  ;;  %v3069_v6 = vld [vmem:[%s6957_s1 + $0x198] sm:$0xf0]  ;;  %v2944_v11 = vor.u32 %v4290_v2, %v2941_v3 }
  0xb9   :  { %1867 = vmatpush.bf16.msrb.mxu0 %v3420_v43  ;;  %v4394_v43 = vld [vmem:[%s6957_s1 + $0x3cc] sm:$0xf]  ;;  %v3104_v50 = vor.u32 %v4330_v34, %v3101_v37  ;;  %v1651_v1 = vadd.f32 %v5923_v9, %v1638_v52  ;;  %v3197_v8 = vld [vmem:[%s6957_s1 + $0x298] sm:$0xf0]  ;;  %v3072_v13 = vor.u32 %v4322_v4, %v3069_v6 }
  0xba   :  { %v3360_v56 = vor.u32 %v4394_v43, %v3357_v46  ;;  %v4386_v9 = vld [vmem:[%s6957_s1 + $0x38c] sm:$0xf]  ;;  %v3325_v10 = vld [vmem:[%s6957_s1 + $0x398] sm:$0xf0] }
  0xbb   :  { %1880 = vmatpush.bf16.msrb.mxu1 %v3548_v47  ;;  %1893 = vmatpush.bf16.msrb.mxu2 %v3676_v48  ;;  %v1639_v47 = vpop.f32.mrf.mxu2  ;;  %v2976_v48 = vor.u32 %v4298_v32, %v2973_v33  ;;  %v4286_v15 = vld [vmem:[%s6957_s1 + $0x6c] sm:$0xf]  ;;  %v2925_v16 = vld [vmem:[%s6957_s1 + $0x78] sm:$0xf0] }
  0xbc   :  { %1906 = vmatpush.bf16.msrb.mxu3 %v3804_v53  ;;  %v4294_v53 = vld [vmem:[%s6957_s1 + $0xac] sm:$0xf]  ;;  %v3053_v25 = vld [vmem:[%s6957_s1 + $0x178] sm:$0xf0] }
  0xbd   :  { %1868 = vmatpush.bf16.msrb.mxu0 %v3404_v60  ;;  %v4390_v60 = vld [vmem:[%s6957_s1 + $0x3ac] sm:$0xf]  ;;  %v2960_v62 = vor.u32 %v4294_v53, %v2957_v54  ;;  %v3181_v27 = vld [vmem:[%s6957_s1 + $0x278] sm:$0xf0]  ;;  %v3056_v32 = vor.u32 %v4318_v17, %v3053_v25 }
  0xbe   :  { %v4350_v26 = vld [vmem:[%s6957_s1 + $0x26c] sm:$0xf]  ;;  %v2909_v35 = vld [vmem:[%s6957_s1 + $0x58] sm:$0xf0] }
  0xbf   :  { %1881 = vmatpush.bf16.msrb.mxu1 %v3532_v63  ;;  %1894 = vmatpush.bf16.msrb.mxu2 %v3660_v0  ;;  %v3088_v63 = vor.u32 %v4326_v55, %v3085_v57  ;;  %v3216_v0 = vor.u32 %v4358_v58, %v3213_v59  ;;  %v3184_v33 = vor.u32 %v4350_v26, %v3181_v27  ;;  %v4282_v34 = vld [vmem:[%s6957_s1 + $0x4c] sm:$0xf]  ;;  %v3037_v40 = vld [vmem:[%s6957_s1 + $0x158] sm:$0xf0] }
  0xc0   :  { %1907 = vmatpush.bf16.msrb.mxu3 %v3788_v5  ;;  %v3344_v5 = vor.u32 %v4390_v60, %v3341_v61  ;;  %v4346_v43 = vld [vmem:[%s6957_s1 + $0x24c] sm:$0xf]  ;;  %v3165_v46 = vld [vmem:[%s6957_s1 + $0x258] sm:$0xf0] }
  0xc1   :  { %1869 = vmatpush.bf16.msrb.mxu0 %v3388_v14  ;;  %v3200_v14 = vor.u32 %v4354_v7, %v3197_v8  ;;  %v4378_v49 = vld [vmem:[%s6957_s1 + $0x34c] sm:$0xf]  ;;  %v2893_v57 = vld [vmem:[%s6957_s1 + $0x38] sm:$0xf0] }
  0xc2   :  { %v4278_v52 = vld [vmem:[%s6957_s1 + $0x2c] sm:$0xf]  ;;  %v3021_v59 = vld [vmem:[%s6957_s1 + $0x138] sm:$0xf0] }
  0xc3   :  { %1882 = vmatpush.bf16.msrb.mxu1 %v3516_v23  ;;  %1895 = vmatpush.bf16.msrb.mxu2 %v3644_v24  ;;  %v1663_v12 = vpop.f32.mrf.mxu0  ;;  %v3328_v24 = vor.u32 %v4386_v9, %v3325_v10  ;;  %v4310_v58 = vld [vmem:[%s6957_s1 + $0x12c] sm:$0xf]  ;;  %v2896_v2 = vor.u32 %v4278_v52, %v2893_v57  ;;  %v2877_v4 = vld [vmem:[%s6957_s1 + $0x18] sm:$0xf0] }
  0xc4   :  { %1908 = vmatpush.bf16.msrb.mxu3 %v3772_v28  ;;  %1870 = vmatmul.bf16.vlgmr.msrb.gmra.mxu0 %v5175_v41  ;;  %v1664_v21 = vadd.f32 %v1663_v12, %v1651_v1  ;;  %v4382_v28 = vld [vmem:[%s6957_s1 + $0x36c] sm:$0xf]  ;;  %v3277_v1 = vld [vmem:[%s6957_s1 + $0x338] sm:$0xf0] }
  0xc5   :  { %1914 = vmatpush.bf16.msra.mxu0 %v2992_v29  ;;  %v1676_v23 = vpop.f32.mrf.mxu1  ;;  %v3309_v29 = vld [vmem:[%s6957_s1 + $0x378] sm:$0xf0]  ;;  %v4274_v3 = vld [vmem:[%s6957_s1 + $0xc] sm:$0xf] }
  0xc6   :  { %1896 = vmatmul.bf16.vlgmr.msrb.gmra.mxu2 %v5167_v38  ;;  %1883 = vmatmul.bf16.vlgmr.msrb.gmra.mxu1 %v5179_v44  ;;  %v3312_v39 = vor.u32 %v4382_v28, %v3309_v29  ;;  %v4306_v7 = vld [vmem:[%s6957_s1 + $0x10c] sm:$0xf]  ;;  %v3005_v8 = vld [vmem:[%s6957_s1 + $0x118] sm:$0xf0] }
  0xc7   :  { %1927 = vmatpush.bf16.msra.mxu1 %v3120_v30  ;;  %1940 = vmatpush.bf16.msra.mxu2 %v3248_v31  ;;  %v1677_v30 = vadd.f32 %v1676_v23, %v1664_v21  ;;  %v2928_v31 = vor.u32 %v4286_v15, %v2925_v16  ;;  %v4338_v9 = vld [vmem:[%s6957_s1 + $0x20c] sm:$0xf]  ;;  %v3133_v12 = vld [vmem:[%s6957_s1 + $0x218] sm:$0xf0]  ;;  %v2880_v23 = vor.u32 %v4274_v3, %v2877_v4 }
  0xc8   :  { %1953 = vmatpush.bf16.msra.mxu3 %v3376_v36  ;;  %v4314_v36 = vld [vmem:[%s6957_s1 + $0x14c] sm:$0xf]  ;;  %v3501_v17 = vld [vmem:[%s6957_s1 + $0x4f8] sm:$0xf0]  ;;  %v3008_v27 = vor.u32 %v4306_v7, %v3005_v8  ;;  %v3136_v28 = vor.u32 %v4338_v9, %v3133_v12 }
  0xc9   :  { %1909 = vmatmul.bf16.vlgmr.msrb.gmra.mxu3 %v5177_v42  ;;  %1915 = vmatpush.bf16.msra.mxu0 %v2976_v48  ;;  %v1689_v37 = vpop.f32.mrf.mxu2  ;;  %v3040_v55 = vor.u32 %v4314_v36, %v3037_v40  ;;  %v4430_v16 = vld [vmem:[%s6957_s1 + $0x4ec] sm:$0xf]  ;;  %v3757_v26 = vld [vmem:[%s6957_s1 + $0x6f8] sm:$0xf0] }
  0xca   :  { %v1690_v47 = vadd.f32 %v1689_v37, %v1677_v30  ;;  %v4462_v21 = vld [vmem:[%s6957_s1 + $0x5ec] sm:$0xf]  ;;  %v3885_v30 = vld [vmem:[%s6957_s1 + $0x7f8] sm:$0xf0] }
  0xcb   :  { %1928 = vmatpush.bf16.msra.mxu1 %v3104_v50  ;;  %1941 = vmatpush.bf16.msra.mxu2 %v3232_v51  ;;  %v3293_v50 = vld [vmem:[%s6957_s1 + $0x358] sm:$0xf0]  ;;  %v2912_v51 = vor.u32 %v4282_v34, %v2909_v35  ;;  %v1665_v54 = vpop.f32.mrf.mxu0  ;;  %v4494_v25 = vld [vmem:[%s6957_s1 + $0x6ec] sm:$0xf] }
  0xcc   :  { %1954 = vmatpush.bf16.msra.mxu3 %v3360_v56  ;;  %v1702_v48 = vpop.f32.mrf.mxu3  ;;  %v3168_v56 = vor.u32 %v4346_v43, %v3165_v46  ;;  %v3296_v61 = vor.u32 %v4378_v49, %v3293_v50  ;;  %v4526_v29 = vld [vmem:[%s6957_s1 + $0x7ec] sm:$0xf]  ;;  %v3760_v34 = vor.u32 %v4494_v25, %v3757_v26  ;;  %v3485_v36 = vld [vmem:[%s6957_s1 + $0x4d8] sm:$0xf0] }
  0xcd   :  { %1916 = vmatpush.bf16.msra.mxu0 %v2960_v62  ;;  %v6077_v53 = vadd.f32 %v1702_v48, %v1690_v47  ;;  %v1678_v60 = vpop.f32.mrf.mxu1  ;;  %v4342_v62 = vld [vmem:[%s6957_s1 + $0x22c] sm:$0xf]  ;;  %v3613_v40 = vld [vmem:[%s6957_s1 + $0x5d8] sm:$0xf0] }
  0xce   :  { %v4426_v35 = vld [vmem:[%s6957_s1 + $0x4cc] sm:$0xf]  ;;  %v3741_v46 = vld [vmem:[%s6957_s1 + $0x6d8] sm:$0xf0] }
  0xcf   :  { %1929 = vmatpush.bf16.msra.mxu1 %v3088_v63  ;;  %1942 = vmatpush.bf16.msra.mxu2 %v3216_v0  ;;  %v3149_v63 = vld [vmem:[%s6957_s1 + $0x238] sm:$0xf0]  ;;  %2018 = vst [vmem:[#allocation2] sm:$0x3f] %v6077_v53  ;;  %v4374_v0 = vld [vmem:[%s6957_s1 + $0x32c] sm:$0xf]  ;;  %v3488_v49 = vor.u32 %v4426_v35, %v3485_v36 }
  0xd0   :  { %1955 = vmatpush.bf16.msra.mxu3 %v3344_v5  ;;  %v3024_v5 = vor.u32 %v4310_v58, %v3021_v59  ;;  %v3152_v6 = vor.u32 %v4342_v62, %v3149_v63  ;;  %v4458_v37 = vld [vmem:[%s6957_s1 + $0x5cc] sm:$0xf]  ;;  %v3869_v48 = vld [vmem:[%s6957_s1 + $0x7d8] sm:$0xf0] }
  0xd1   :  { %1917 = vmatpush.bf16.msra.mxu0 %v2944_v11  ;;  %v1691_v10 = vpop.f32.mrf.mxu2  ;;  %v3280_v11 = vor.u32 %v4374_v0, %v3277_v1  ;;  %v4490_v43 = vld [vmem:[%s6957_s1 + $0x6cc] sm:$0xf]  ;;  %v3616_v50 = vor.u32 %v4458_v37, %v3613_v40  ;;  %v3469_v54 = vld [vmem:[%s6957_s1 + $0x4b8] sm:$0xf0] }
  0xd2   :  { %v4522_v47 = vld [vmem:[%s6957_s1 + $0x7cc] sm:$0xf]  ;;  %v3597_v57 = vld [vmem:[%s6957_s1 + $0x5b8] sm:$0xf0] }
  0xd3   :  { %1930 = vmatpush.bf16.msra.mxu1 %v3072_v13  ;;  %1943 = vmatpush.bf16.msra.mxu2 %v3200_v14  ;;  %v4370_v13 = vld [vmem:[%s6957_s1 + $0x30c] sm:$0xf]  ;;  %v3261_v14 = vld [vmem:[%s6957_s1 + $0x318] sm:$0xf0] }
  0xd4   :  { %1956 = vmatpush.bf16.msra.mxu3 %v3328_v24  ;;  %v1704_v15 = vpop.f32.mrf.mxu3  ;;  %v3629_v24 = vld [vmem:[%s6957_s1 + $0x5f8] sm:$0xf0]  ;;  %v4422_v52 = vld [vmem:[%s6957_s1 + $0x4ac] sm:$0xf] }
  0xd5   :  { %1918 = vmatpush.bf16.msra.mxu0 %v2928_v31  ;;  %v3264_v31 = vor.u32 %v4370_v13, %v3261_v14  ;;  %v4486_v58 = vld [vmem:[%s6957_s1 + $0x6ac] sm:$0xf]  ;;  %v3725_v59 = vld [vmem:[%s6957_s1 + $0x6b8] sm:$0xf0] }
  0xd6   :  { %v4518_v60 = vld [vmem:[%s6957_s1 + $0x7ac] sm:$0xf]  ;;  %v3728_v63 = vor.u32 %v4486_v58, %v3725_v59  ;;  %v3453_v1 = vld [vmem:[%s6957_s1 + $0x498] sm:$0xf0]  ;;  %v287_v58 = vperm.slane %v5872_v45, 1 }
  0xd7   :  { %1931 = vmatpush.bf16.msra.mxu1 %v3056_v32  ;;  %1944 = vmatpush.bf16.msra.mxu2 %v3184_v33  ;;  %v3504_v32 = vor.u32 %v4430_v16, %v3501_v17  ;;  %v3632_v33 = vor.u32 %v4462_v21, %v3629_v24  ;;  %v4418_v0 = vld [vmem:[%s6957_s1 + $0x48c] sm:$0xf]  ;;  %v3709_v3 = vld [vmem:[%s6957_s1 + $0x698] sm:$0xf0] }
  0xd8   :  { %1957 = vmatpush.bf16.msra.mxu3 %v3312_v39  ;;  %v3888_v39 = vor.u32 %v4526_v29, %v3885_v30  ;;  %v4514_v4 = vld [vmem:[%s6957_s1 + $0x78c] sm:$0xf]  ;;  %v3565_v15 = vld [vmem:[%s6957_s1 + $0x578] sm:$0xf0] }
  0xd9   :  { %1919 = vmatpush.bf16.msra.mxu0 %v2912_v51  ;;  %v3744_v51 = vor.u32 %v4490_v43, %v3741_v46  ;;  %v4414_v10 = vld [vmem:[%s6957_s1 + $0x46c] sm:$0xf]  ;;  %v3693_v17 = vld [vmem:[%s6957_s1 + $0x678] sm:$0xf0] }
  0xda   :  { %v4446_v12 = vld [vmem:[%s6957_s1 + $0x56c] sm:$0xf]  ;;  %v3805_v37 = vld [vmem:[%s6957_s1 + $0x758] sm:$0xf0] }
  0xdb   :  { %1932 = vmatpush.bf16.msra.mxu1 %v3040_v55  ;;  %1945 = vmatpush.bf16.msra.mxu2 %v3168_v56  ;;  %v4454_v55 = vld [vmem:[%s6957_s1 + $0x5ac] sm:$0xf]  ;;  %v3872_v56 = vor.u32 %v4522_v47, %v3869_v48  ;;  %v3568_v25 = vor.u32 %v4446_v12, %v3565_v15  ;;  %v3405_v48 = vld [vmem:[%s6957_s1 + $0x438] sm:$0xf0] }
  0xdc   :  { %1958 = vmatpush.bf16.msra.mxu3 %v3296_v61  ;;  %v3472_v61 = vor.u32 %v4422_v52, %v3469_v54  ;;  %v3600_v62 = vor.u32 %v4454_v55, %v3597_v57  ;;  %v4478_v16 = vld [vmem:[%s6957_s1 + $0x66c] sm:$0xf]  ;;  %v3533_v52 = vld [vmem:[%s6957_s1 + $0x538] sm:$0xf0] }
  0xdd   :  { %1920 = vmatpush.bf16.msra.mxu0 %v2896_v2  ;;  %v4482_v2 = vld [vmem:[%s6957_s1 + $0x68c] sm:$0xf]  ;;  %v3696_v26 = vor.u32 %v4478_v16, %v3693_v17  ;;  %v3661_v55 = vld [vmem:[%s6957_s1 + $0x638] sm:$0xf0]  ;;  %v4599_v16 = vld [vmem:[%s6959_s3 + $0x230] sm:$0xf0] }
  0xde   :  { %v3712_v9 = vor.u32 %v4482_v2, %v3709_v3  ;;  %v4510_v21 = vld [vmem:[%s6957_s1 + $0x76c] sm:$0xf]  ;;  %v3789_v57 = vld [vmem:[%s6957_s1 + $0x738] sm:$0xf0] }
  0xdf   :  { %1933 = vmatpush.bf16.msra.mxu1 %v3024_v5  ;;  %1946 = vmatpush.bf16.msra.mxu2 %v3152_v6  ;;  %v3837_v5 = vld [vmem:[%s6957_s1 + $0x798] sm:$0xf0]  ;;  %v3456_v6 = vor.u32 %v4418_v0, %v3453_v1  ;;  %v4442_v29 = vld [vmem:[%s6957_s1 + $0x54c] sm:$0xf] }
  0xe0   :  { %1959 = vmatpush.bf16.msra.mxu3 %v3280_v11  ;;  %v3437_v11 = vld [vmem:[%s6957_s1 + $0x478] sm:$0xf0]  ;;  %v3840_v14 = vor.u32 %v4514_v4, %v3837_v5  ;;  %v4506_v36 = vld [vmem:[%s6957_s1 + $0x74c] sm:$0xf]  ;;  %v3975_v4 = vld [vmem:[%s6959_s3 + $0xa8] sm:$0xf] }
  0xe1   :  { %1921 = vmatpush.bf16.msra.mxu0 %v2880_v23  ;;  %v6225_v7 = vpop.f32.mrf.mxu0  ;;  %v3821_v23 = vld [vmem:[%s6957_s1 + $0x778] sm:$0xf0]  ;;  %v3440_v24 = vor.u32 %v4414_v10, %v3437_v11  ;;  %v4406_v47 = vld [vmem:[%s6957_s1 + $0x42c] sm:$0xf]  ;;  %v4551_v5 = vld [vmem:[%s6959_s3 + $0xb0] sm:$0xf0] }
  0xe2   :  { %v4470_v54 = vld [vmem:[%s6957_s1 + $0x62c] sm:$0xf]  ;;  %v3408_v59 = vor.u32 %v4406_v47, %v3405_v48  ;;  %v3517_v45 = vld [vmem:[%s6957_s1 + $0x518] sm:$0xf0]  ;;  %v4575_v10 = vld [vmem:[%s6959_s3 + $0x170] sm:$0xf0]  ;;  %v3976_v15 = vor.u32 %v4551_v5, %v3975_v4 }
  0xe3   :  { %1934 = vmatpush.bf16.msra.mxu1 %v3008_v27  ;;  %1947 = vmatpush.bf16.msra.mxu2 %v3136_v28  ;;  %v6236_v13 = vpop.f32.mrf.mxu1  ;;  %v4410_v27 = vld [vmem:[%s6957_s1 + $0x44c] sm:$0xf]  ;;  %v3421_v28 = vld [vmem:[%s6957_s1 + $0x458] sm:$0xf0] }
  0xe4   :  { %1960 = vmatpush.bf16.msra.mxu3 %v3264_v31  ;;  %1922 = vmatmul.bf16.vlgmr.msra.gmra.mxu0 %v5013_v19  ;;  %v4450_v19 = vld [vmem:[%s6957_s1 + $0x58c] sm:$0xf]  ;;  %v3824_v31 = vor.u32 %v4510_v21, %v3821_v23  ;;  %v3773_v3 = vld [vmem:[%s6957_s1 + $0x718] sm:$0xf0]  ;;  %v3963_v21 = vld [vmem:[%s6959_s3 + $0x90] sm:$0xf] }
  0xe5   :  { %1966 = vmatpush.bf16.msrb.mxu0 %v3504_v32  ;;  %v3549_v32 = vld [vmem:[%s6957_s1 + $0x558] sm:$0xf0]  ;;  %v4566_v47 = vld [vmem:[%s6959_s3 + $0x128] sm:$0xf0] }
  0xe6   :  { %1948 = vmatmul.bf16.vlgmr.msra.gmra.mxu2 %v5011_v18  ;;  %v3853_v18 = vld [vmem:[%s6957_s1 + $0x7b8] sm:$0xf0]  ;;  %1935 = vmatmul.bf16.vlgmr.msra.gmra.mxu1 %v5017_v22  ;;  %v3552_v43 = vor.u32 %v4442_v29, %v3549_v32  ;;  %v4155_v29 = vld [vmem:[%s6959_s3 + $0x210] sm:$0xf] }
  0xe7   :  { %1979 = vmatpush.bf16.msrb.mxu1 %v3632_v33  ;;  %1992 = vmatpush.bf16.msrb.mxu2 %v3760_v34  ;;  %v3581_v22 = vld [vmem:[%s6957_s1 + $0x598] sm:$0xf0]  ;;  %v4474_v33 = vld [vmem:[%s6957_s1 + $0x64c] sm:$0xf] }
  0xe8   :  { %2005 = vmatpush.bf16.msrb.mxu3 %v3888_v39  ;;  %v3584_v8 = vor.u32 %v4450_v19, %v3581_v22  ;;  %v3677_v34 = vld [vmem:[%s6957_s1 + $0x658] sm:$0xf0]  ;;  %v3424_v39 = vor.u32 %v4410_v27, %v3421_v28  ;;  %v4466_v19 = vld [vmem:[%s6957_s1 + $0x60c] sm:$0xf] }
  0xe9   :  { %1961 = vmatmul.bf16.vlgmr.msra.gmra.mxu3 %v5015_v20  ;;  %1967 = vmatpush.bf16.msrb.mxu0 %v3488_v49  ;;  %v3856_v20 = vor.u32 %v4518_v60, %v3853_v18  ;;  %v6262_v30 = vpop.f32.mrf.mxu2  ;;  %v1717_v40 = vpop.f32.mrf.mxu0  ;;  %v3680_v46 = vor.u32 %v4474_v33, %v3677_v34  ;;  %v4438_v49 = vld [vmem:[%s6957_s1 + $0x52c] sm:$0xf]  ;;  %v4548_v23 = vld [vmem:[%s6959_s3 + $0x98] sm:$0xf0]  ;;  %v3951_v33 = vld [vmem:[%s6959_s3 + $0x78] sm:$0xf] }
  0xea   :  { %v4402_v60 = vld [vmem:[%s6957_s1 + $0x40c] sm:$0xf]  ;;  %v3536_v18 = vor.u32 %v4438_v49, %v3533_v52  ;;  %v3964_v28 = vor.u32 %v4548_v23, %v3963_v21  ;;  %v4545_v34 = vld [vmem:[%s6959_s3 + $0x80] sm:$0xf0]  ;;  %v4095_v23 = vld [vmem:[%s6959_s3 + $0x198] sm:$0xf] }
  0xeb   :  { %1980 = vmatpush.bf16.msrb.mxu1 %v3616_v50  ;;  %1993 = vmatpush.bf16.msrb.mxu2 %v3744_v51  ;;  %v1730_v50 = vpop.f32.mrf.mxu1  ;;  %v3808_v51 = vor.u32 %v4506_v36, %v3805_v37  ;;  %v4498_v22 = vld [vmem:[%s6957_s1 + $0x70c] sm:$0xf]  ;;  %v4047_v36 = vld [vmem:[%s6959_s3 + $0x138] sm:$0xf]  ;;  %v3952_v37 = vor.u32 %v4545_v34, %v3951_v33 }
  0xec   :  { %2006 = vmatpush.bf16.msrb.mxu3 %v3872_v56  ;;  %v6273_v35 = vpop.f32.mrf.mxu3  ;;  %v4502_v56 = vld [vmem:[%s6957_s1 + $0x72c] sm:$0xf]  ;;  %v4131_v50 = vld [vmem:[%s6959_s3 + $0x1e0] sm:$0xf] }
  0xed   :  { %1968 = vmatpush.bf16.msrb.mxu0 %v3472_v61  ;;  %v3664_v61 = vor.u32 %v4470_v54, %v3661_v55  ;;  %v3792_v1 = vor.u32 %v4502_v56, %v3789_v57  ;;  %v3927_v54 = vld [vmem:[%s6959_s3 + $0x48] sm:$0xf]  ;;  %v4539_v55 = vld [vmem:[%s6959_s3 + $0x50] sm:$0xf0]  ;;  %v4574_v34 = vld [vmem:[%s6959_s3 + $0x16c] sm:$0xf] }
  0xef   :  { %1981 = vmatpush.bf16.msrb.mxu1 %v3600_v62  ;;  %1994 = vmatpush.bf16.msrb.mxu2 %v3728_v63  ;;  %v3389_v62 = vld [vmem:[%s6957_s1 + $0x418] sm:$0xf0]  ;;  %v4434_v63 = vld [vmem:[%s6957_s1 + $0x50c] sm:$0xf] }
  0xf0   :  { %2007 = vmatpush.bf16.msrb.mxu3 %v3856_v20  ;;  %v3645_v20 = vld [vmem:[%s6957_s1 + $0x618] sm:$0xf0]  ;;  %v3520_v11 = vor.u32 %v4434_v63, %v3517_v45  ;;  %v4587_v63 = vld [vmem:[%s6959_s3 + $0x1d0] sm:$0xf0] }
  0xf1   :  { %1969 = vmatpush.bf16.msrb.mxu0 %v3456_v6  ;;  %v1743_v0 = vpop.f32.mrf.mxu2  ;;  %v1716_v6 = vadd.f32 %v6225_v7, %v287_v58  ;;  %v3648_v12 = vor.u32 %v4466_v19, %v3645_v20  ;;  %v4167_v7 = vld [vmem:[%s6959_s3 + $0x228] sm:$0xf]  ;;  %v4011_v20 = vld [vmem:[%s6959_s3 + $0xf0] sm:$0xf] }
  0xf2   :  { %v4168_v27 = vor.u32 %v4599_v16, %v4167_v7  ;;  %v4023_v58 = vld [vmem:[%s6959_s3 + $0x108] sm:$0xf]  ;;  %v3915_v0 = vld [vmem:[%s6959_s3 + $0x30] sm:$0xf]  ;;  %v3999_v7 = vld [vmem:[%s6959_s3 + $0xd8] sm:$0xf] }
  0xf3   :  { %1982 = vmatpush.bf16.msrb.mxu1 %v3584_v8  ;;  %1995 = vmatpush.bf16.msrb.mxu2 %v3712_v9  ;;  %v3392_v8 = vor.u32 %v4402_v60, %v3389_v62  ;;  %v4071_v9 = vld [vmem:[%s6959_s3 + $0x168] sm:$0xf]  ;;  %v4557_v16 = vld [vmem:[%s6959_s3 + $0xe0] sm:$0xf0] }
  0xf4   :  { %2008 = vmatpush.bf16.msrb.mxu3 %v3840_v14  ;;  %v1756_v2 = vpop.f32.mrf.mxu3  ;;  %v3776_v14 = vor.u32 %v4498_v22, %v3773_v3  ;;  %v4072_v17 = vor.u32 %v4575_v10, %v4071_v9  ;;  %v4119_v62 = vld [vmem:[%s6959_s3 + $0x1c8] sm:$0xf]  ;;  %v4560_v22 = vld [vmem:[%s6959_s3 + $0xf8] sm:$0xf0]  ;;  %v4107_v9 = vld [vmem:[%s6959_s3 + $0x1b0] sm:$0xf] }
  0xf5   :  { %1970 = vmatpush.bf16.msrb.mxu0 %v3440_v24  ;;  %v1729_v24 = vadd.f32 %v6236_v13, %v1716_v6  ;;  %v4596_v13 = vld [vmem:[%s6959_s3 + $0x218] sm:$0xf0]  ;;  %v4120_v4 = vor.u32 %v4587_v63, %v4119_v62  ;;  %v4145_v63 = vld [vmem:[%s6959_s3 + $0x204] sm:$0xf0] }
  0xf6   :  { %v4584_v10 = vld [vmem:[%s6959_s3 + $0x1b8] sm:$0xf0] }
  0xf7   :  { %1983 = vmatpush.bf16.msrb.mxu1 %v3568_v25  ;;  %1996 = vmatpush.bf16.msrb.mxu2 %v3696_v26  ;;  %v4059_v25 = vld [vmem:[%s6959_s3 + $0x150] sm:$0xf]  ;;  %v4572_v26 = vld [vmem:[%s6959_s3 + $0x158] sm:$0xf0]  ;;  %v1742_v32 = vadd.f32 %v6262_v30, %v1729_v24  ;;  %v4156_v30 = vor.u32 %v4596_v13, %v4155_v29  ;;  %v4581_v24 = vld [vmem:[%s6959_s3 + $0x1a0] sm:$0xf0] }
  0xf8   :  { %2009 = vmatpush.bf16.msrb.mxu3 %v3824_v31  ;;  %v4060_v31 = vor.u32 %v4572_v26, %v4059_v25  ;;  %v4000_v25 = vor.u32 %v4557_v16, %v3999_v7  ;;  %v3891_v26 = vld [vmem:[%s6959_s3] sm:$0xf]  ;;  %v4554_v13 = vld [vmem:[%s6959_s3 + $0xc8] sm:$0xf0]  ;;  %v4592_v62 = vld [vmem:[%s6959_s3 + $0x1fc] sm:$0xf] }
  0xf9   :  { %1971 = vmatpush.bf16.msrb.mxu0 %v3424_v39  ;;  %v1755_v40 = vadd.f32 %v6273_v35, %v1742_v32  ;;  %v3977_v32 = vld [vmem:[%s6959_s3 + $0xb4] sm:$0xf0]  ;;  %v4586_v7 = vld [vmem:[%s6959_s3 + $0x1cc] sm:$0xf] }
  0xfa   :  { %v4121_v16 = vld [vmem:[%s6959_s3 + $0x1d4] sm:$0xf0] }
  0xfb   :  { %1984 = vmatpush.bf16.msrb.mxu1 %v3552_v43  ;;  %1997 = vmatpush.bf16.msrb.mxu2 %v3680_v46  ;;  %v4542_v43 = vld [vmem:[%s6959_s3 + $0x68] sm:$0xf0]  ;;  %v4035_v46 = vld [vmem:[%s6959_s3 + $0x120] sm:$0xf] }
  0xfc   :  { %2010 = vmatpush.bf16.msrb.mxu3 %v3808_v51  ;;  %v4590_v51 = vld [vmem:[%s6959_s3 + $0x1e8] sm:$0xf0]  ;;  %v4036_v52 = vor.u32 %v4566_v47, %v4035_v46  ;;  %v4547_v46 = vld [vmem:[%s6959_s3 + $0x94] sm:$0xf]  ;;  %v3965_v47 = vld [vmem:[%s6959_s3 + $0x9c] sm:$0xf0] }
  0xfd   :  { %1972 = vmatpush.bf16.msrb.mxu0 %v3408_v59  ;;  %v4563_v59 = vld [vmem:[%s6959_s3 + $0x110] sm:$0xf0] }
  0xfe   :  { %v4024_v45 = vor.u32 %v4563_v59, %v4023_v58  ;;  %v4544_v58 = vld [vmem:[%s6959_s3 + $0x7c] sm:$0xf] }
  0xff   :  { %1985 = vmatpush.bf16.msrb.mxu1 %v3536_v18  ;;  %1998 = vmatpush.bf16.msrb.mxu2 %v3664_v61  ;;  %v4132_v18 = vor.u32 %v4590_v51, %v4131_v50  ;;  %v3928_v61 = vor.u32 %v4539_v55, %v3927_v54  ;;  %v3968_v54 = vor.u32 %v4547_v46, %v3965_v47  ;;  %v4595_v55 = vld [vmem:[%s6959_s3 + $0x214] sm:$0xf]  ;;  %v4568_v59 = vld [vmem:[%s6959_s3 + $0x13c] sm:$0xf]  ;;  %v4097_v47 = vld [vmem:[%s6959_s3 + $0x1a4] sm:$0xf0] }
 0x100   :  { %2011 = vmatpush.bf16.msrb.mxu3 %v3792_v1  ;;  %v4536_v1 = vld [vmem:[%s6959_s3 + $0x38] sm:$0xf0] }
 0x101   :  { %1973 = vmatpush.bf16.msrb.mxu0 %v3392_v8  ;;  %v1767_v49 = vpop.f32.mrf.mxu0  ;;  %v3916_v5 = vor.u32 %v4536_v1, %v3915_v0  ;;  %v4541_v0 = vld [vmem:[%s6959_s3 + $0x64] sm:$0xf]  ;;  %v3941_v1 = vld [vmem:[%s6959_s3 + $0x6c] sm:$0xf0]  ;;  %v4580_v46 = vld [vmem:[%s6959_s3 + $0x19c] sm:$0xf] }
 0x102   :  { %v1768_v56 = vadd.f32 %v1767_v49, %v1755_v40  ;;  %v4598_v40 = vld [vmem:[%s6959_s3 + $0x22c] sm:$0xf] }
 0x103   :  { %1986 = vmatpush.bf16.msrb.mxu1 %v3520_v11  ;;  %1999 = vmatpush.bf16.msrb.mxu2 %v3648_v12  ;;  %v1780_v57 = vpop.f32.mrf.mxu1  ;;  %v4012_v11 = vor.u32 %v4560_v22, %v4011_v20  ;;  %v3903_v12 = vld [vmem:[%s6959_s3 + $0x18] sm:$0xf]  ;;  %v4037_v20 = vld [vmem:[%s6959_s3 + $0x12c] sm:$0xf0]  ;;  %v4148_v22 = vor.u32 %v4592_v62, %v4145_v63 }
 0x104   :  { %2012 = vmatpush.bf16.msrb.mxu3 %v3776_v14  ;;  %1974 = vmatmul.bf16.vlgmr.msrb.gmra.mxu0 %v5175_v41  ;;  %v4569_v41 = vld [vmem:[%s6959_s3 + $0x140] sm:$0xf0]  ;;  %v1781_v60 = vadd.f32 %v1780_v57, %v1768_v56  ;;  %v4157_v56 = vld [vmem:[%s6959_s3 + $0x21c] sm:$0xf0] }
 0x105   :  { %2674 = vmatpush.bf16.msra.mxu0 %v3976_v15  ;;  %v4048_v39 = vor.u32 %v4569_v41, %v4047_v36  ;;  %v4533_v14 = vld [vmem:[%s6959_s3 + $0x20] sm:$0xf0]  ;;  %v4073_v36 = vld [vmem:[%s6959_s3 + $0x174] sm:$0xf0]  ;;  %v4096_v41 = vor.u32 %v4581_v24, %v4095_v23  ;;  %v3917_v23 = vld [vmem:[%s6959_s3 + $0x3c] sm:$0xf0] }
 0x106   :  { %1987 = vmatmul.bf16.vlgmr.msrb.gmra.mxu1 %v5179_v44  ;;  %2000 = vmatmul.bf16.vlgmr.msrb.gmra.mxu2 %v5167_v38  ;;  %v4143_v44 = vld [vmem:[%s6959_s3 + $0x1f8] sm:$0xf]  ;;  %v4593_v38 = vld [vmem:[%s6959_s3 + $0x200] sm:$0xf0]  ;;  %v3904_v21 = vor.u32 %v4533_v14, %v3903_v12  ;;  %v4559_v24 = vld [vmem:[%s6959_s3 + $0xf4] sm:$0xf] }
 0x107   :  { %2687 = vmatpush.bf16.msra.mxu1 %v4072_v17  ;;  %2013 = vmatmul.bf16.vlgmr.msrb.gmra.mxu3 %v5177_v42  ;;  %v3939_v42 = vld [vmem:[%s6959_s3 + $0x60] sm:$0xf]  ;;  %v4144_v48 = vor.u32 %v4593_v38, %v4143_v44  ;;  %v4108_v17 = vor.u32 %v4584_v10, %v4107_v9  ;;  %v4578_v44 = vld [vmem:[%s6959_s3 + $0x188] sm:$0xf0] }
 0x108   :  { %2700 = vmatpush.bf16.msra.mxu2 %v4168_v27  ;;  %v3940_v35 = vor.u32 %v4542_v43, %v3939_v42  ;;  %v4530_v27 = vld [vmem:[%s6959_s3 + $0x8] sm:$0xf0]  ;;  %v4169_v42 = vld [vmem:[%s6959_s3 + $0x234] sm:$0xf0]  ;;  %v4076_v43 = vor.u32 %v4574_v34, %v4073_v36  ;;  %v3905_v34 = vld [vmem:[%s6959_s3 + $0x24] sm:$0xf0] }
 0x109   :  { %2675 = vmatpush.bf16.msra.mxu0 %v3964_v28  ;;  %v1793_v19 = vpop.f32.mrf.mxu2  ;;  %v1769_v8 = vpop.f32.mrf.mxu0  ;;  %v3987_v28 = vld [vmem:[%s6959_s3 + $0xc0] sm:$0xf]  ;;  %v4172_v51 = vor.u32 %v4598_v40, %v4169_v42  ;;  %v4562_v10 = vld [vmem:[%s6959_s3 + $0x10c] sm:$0xf] }
 0x10a   :  { %v1794_v2 = vadd.f32 %v1793_v19, %v1781_v60  ;;  %v3988_v38 = vor.u32 %v4554_v13, %v3987_v28  ;;  %v4049_v60 = vld [vmem:[%s6959_s3 + $0x144] sm:$0xf0]  ;;  %v4565_v19 = vld [vmem:[%s6959_s3 + $0x124] sm:$0xf]  ;;  %v3929_v8 = vld [vmem:[%s6959_s3 + $0x54] sm:$0xf0]  ;;  %v4124_v28 = vor.u32 %v4586_v7, %v4121_v16 }
 0x10b   :  { %2688 = vmatpush.bf16.msra.mxu1 %v4060_v31  ;;  %v1782_v15 = vpop.f32.mrf.mxu1  ;;  %v4550_v31 = vld [vmem:[%s6959_s3 + $0xac] sm:$0xf]  ;;  %v4583_v13 = vld [vmem:[%s6959_s3 + $0x1b4] sm:$0xf]  ;;  %v4227_v7 = vld [vmem:[%s6959_s3 + $0x2a0] sm:$0xf] }
 0x10c   :  { %2701 = vmatpush.bf16.msra.mxu2 %v4156_v30  ;;  %v1806_v3 = vpop.f32.mrf.mxu3  ;;  %v3892_v30 = vor.u32 %v4530_v27, %v3891_v26 }
 0x10d   :  { %2676 = vmatpush.bf16.msra.mxu0 %v3952_v37  ;;  %v1807_v6 = vadd.f32 %v1806_v3, %v1794_v2  ;;  %v4083_v37 = vld [vmem:[%s6959_s3 + $0x180] sm:$0xf]  ;;  %v3944_v2 = vor.u32 %v4541_v0, %v3941_v1  ;;  %v4589_v3 = vld [vmem:[%s6959_s3 + $0x1e4] sm:$0xf]  ;;  %v4251_v0 = vld [vmem:[%s6959_s3 + $0x2d0] sm:$0xf] }
 0x10e   :  { %v4084_v49 = vor.u32 %v4578_v44, %v4083_v37  ;;  %v6619_v44 = vld [vmem:[%s6958_s2] sm:$0xf]  ;;  %v4620_v1 = vld [vmem:[%s6959_s3 + $0x2d8] sm:$0xf0] }
 0x10f   :  { %2689 = vmatpush.bf16.msra.mxu1 %v4048_v39  ;;  %2019 = vst [vmem:[#allocation2 + $0x8] sm:$0x3f] %v1807_v6  ;;  %v3980_v39 = vor.u32 %v4550_v31, %v3977_v32  ;;  %v6512_v50 = vpack.c.bf16 %v1807_v6, %v1807_v6  ;;  %v4538_v6 = vld [vmem:[%s6959_s3 + $0x4c] sm:$0xf]  ;;  %v4109_v31 = vld [vmem:[%s6959_s3 + $0x1bc] sm:$0xf0] }
 0x110   :  { %2702 = vmatpush.bf16.msra.mxu2 %v4144_v48  ;;  %v4571_v48 = vld [vmem:[%s6959_s3 + $0x154] sm:$0xf]  ;;  %v3932_v15 = vor.u32 %v4538_v6, %v3929_v8  ;;  %v4112_v40 = vor.u32 %v4583_v13, %v4109_v31  ;;  %v4573_v6 = vld [vmem:[%s6959_s3 + $0x160] sm:$0xf0]  ;;  %v3947_v31 = vld [vmem:[%s6959_s3 + $0x68] sm:$0xf] }
 0x111   :  { %2677 = vmatpush.bf16.msra.mxu0 %v3940_v35  ;;  %v1795_v29 = vpop.f32.mrf.mxu2  ;;  %v4061_v35 = vld [vmem:[%s6959_s3 + $0x15c] sm:$0xf0] }
 0x112   :  { %v4064_v57 = vor.u32 %v4571_v48, %v4061_v35  ;;  %v4553_v35 = vld [vmem:[%s6959_s3 + $0xc4] sm:$0xf] }
 0x113   :  { %2690 = vmatpush.bf16.msra.mxu1 %v4036_v52  ;;  %v6516_v52 = vpack.c.bf16 %v6077_v53, %v6077_v53  ;;  %v3953_v53 = vld [vmem:[%s6959_s3 + $0x84] sm:$0xf0] }
 0x114   :  { %2703 = vmatpush.bf16.msra.mxu2 %v4132_v18  ;;  %v1808_v33 = vpop.f32.mrf.mxu3  ;;  %v4160_v18 = vor.u32 %v4595_v55, %v4157_v56  ;;  %v3983_v55 = vld [vmem:[%s6959_s3 + $0xb0] sm:$0xf]  ;;  %v4552_v56 = vld [vmem:[%s6959_s3 + $0xb8] sm:$0xf0] }
 0x115   :  { %2678 = vmatpush.bf16.msra.mxu0 %v3928_v61  ;;  %v3956_v61 = vor.u32 %v4544_v58, %v3953_v53  ;;  %v4532_v33 = vld [vmem:[%s6959_s3 + $0x1c] sm:$0xf]  ;;  %v4079_v53 = vld [vmem:[%s6959_s3 + $0x170] sm:$0xf] }
 0x116   :  { %v3908_v42 = vor.u32 %v4532_v33, %v3905_v34  ;;  %v4567_v33 = vld [vmem:[%s6959_s3 + $0x130] sm:$0xf0]  ;;  %v4215_v34 = vld [vmem:[%s6959_s3 + $0x288] sm:$0xf] }
 0x117   :  { %2691 = vmatpush.bf16.msra.mxu1 %v4024_v45  ;;  %v4052_v45 = vor.u32 %v4568_v59, %v4049_v60  ;;  %v4576_v59 = vld [vmem:[%s6959_s3 + $0x178] sm:$0xf0] }
 0x118   :  { %2704 = vmatpush.bf16.msra.mxu2 %v4120_v4  ;;  %v4133_v4 = vld [vmem:[%s6959_s3 + $0x1ec] sm:$0xf0] }
 0x119   :  { %2679 = vmatpush.bf16.msra.mxu0 %v3916_v5  ;;  %v4040_v5 = vor.u32 %v4565_v19, %v4037_v20  ;;  %v4136_v14 = vor.u32 %v4589_v3, %v4133_v4  ;;  %v3984_v20 = vor.u32 %v4552_v56, %v3983_v55  ;;  %v3971_v3 = vld [vmem:[%s6959_s3 + $0x98] sm:$0xf]  ;;  %v4549_v4 = vld [vmem:[%s6959_s3 + $0xa0] sm:$0xf0] }
 0x11a   :  { %v4605_v55 = vld [vmem:[%s6959_s3 + $0x260] sm:$0xf0] }
 0x11b   :  { %2692 = vmatpush.bf16.msra.mxu1 %v4012_v11  ;;  %v4025_v11 = vld [vmem:[%s6959_s3 + $0x114] sm:$0xf0] }
 0x11c   :  { %2705 = vmatpush.bf16.msra.mxu2 %v4108_v17  ;;  %v4028_v17 = vor.u32 %v4562_v10, %v4025_v11  ;;  %v4239_v10 = vld [vmem:[%s6959_s3 + $0x2b8] sm:$0xf]  ;;  %v4617_v11 = vld [vmem:[%s6959_s3 + $0x2c0] sm:$0xf0] }
 0x11d   :  { %2680 = vmatpush.bf16.msra.mxu0 %v3904_v21  ;;  %v4535_v21 = vld [vmem:[%s6959_s3 + $0x34] sm:$0xf] }
 0x11e   :  { %v3920_v29 = vor.u32 %v4535_v21, %v3917_v23  ;;  %v4546_v21 = vld [vmem:[%s6959_s3 + $0x88] sm:$0xf0]  ;;  %v4055_v23 = vld [vmem:[%s6959_s3 + $0x140] sm:$0xf] }
 0x11f   :  { %2693 = vmatpush.bf16.msra.mxu1 %v4000_v25  ;;  %v4013_v25 = vld [vmem:[%s6959_s3 + $0xfc] sm:$0xf0] }
 0x120   :  { %2706 = vmatpush.bf16.msra.mxu2 %v4096_v41  ;;  %v4016_v32 = vor.u32 %v4559_v24, %v4013_v25  ;;  %v4556_v41 = vld [vmem:[%s6959_s3 + $0xdc] sm:$0xf]  ;;  %v4570_v24 = vld [vmem:[%s6959_s3 + $0x148] sm:$0xf0] }
 0x121   :  { %2681 = vmatpush.bf16.msra.mxu0 %v3892_v30  ;;  %v1819_v9 = vpop.f32.mrf.mxu0  ;;  %v4001_v30 = vld [vmem:[%s6959_s3 + $0xe4] sm:$0xf0]  ;;  %v4056_v13 = vor.u32 %v4570_v24, %v4055_v23 }
 0x122   :  { %v4004_v48 = vor.u32 %v4556_v41, %v4001_v30  ;;  %v3899_v24 = vld [vmem:[%s6959_s3 + $0x8] sm:$0xf] }
 0x123   :  { %2694 = vmatpush.bf16.msra.mxu1 %v3988_v38  ;;  %v6574_v12 = vpop.f32.mrf.mxu1  ;;  %v288_v38 = vperm.slane %v6619_v44, 2 }
 0x124   :  { %2682 = vmatmul.bf16.vlgmr.msra.gmra.mxu0 %v6516_v52  ;;  %2707 = vmatpush.bf16.msra.mxu2 %v4084_v49  ;;  %v4263_v49 = vld [vmem:[%s6959_s3 + $0x2e8] sm:$0xf] }
 0x125   :  { %2726 = vmatpush.bf16.msrb.mxu0 %v3980_v39  ;;  %v4529_v39 = vld [vmem:[%s6959_s3 + $0x4] sm:$0xf]  ;;  %v1820_v62 = vadd.f32 %v1819_v9, %v288_v38  ;;  %v4203_v38 = vld [vmem:[%s6959_s3 + $0x270] sm:$0xf] }
 0x126   :  { %2695 = vmatmul.bf16.vlgmr.msra.gmra.mxu1 %v6512_v50 }
 0x127   :  { %2739 = vmatpush.bf16.msrb.mxu1 %v4076_v43  ;;  %v3893_v43 = vld [vmem:[%s6959_s3 + $0xc] sm:$0xf0]  ;;  %v1833_v9 = vadd.f32 %v6574_v12, %v1820_v62  ;;  %v4614_v12 = vld [vmem:[%s6959_s3 + $0x2a8] sm:$0xf0] }
 0x128   :  { %2752 = vmatpush.bf16.msrb.mxu2 %v4172_v51  ;;  %v4623_v51 = vld [vmem:[%s6959_s3 + $0x2f0] sm:$0xf0]  ;;  %v3896_v63 = vor.u32 %v4529_v39, %v3893_v43  ;;  %v4608_v39 = vld [vmem:[%s6959_s3 + $0x278] sm:$0xf0] }
 0x129   :  { %2727 = vmatpush.bf16.msrb.mxu0 %v3968_v54  ;;  %v6594_v26 = vpop.f32.mrf.mxu2  ;;  %v1821_v36 = vpop.f32.mrf.mxu0  ;;  %v3989_v54 = vld [vmem:[%s6959_s3 + $0xcc] sm:$0xf0]  ;;  %v4264_v58 = vor.u32 %v4623_v51, %v4263_v49  ;;  %v4204_v49 = vor.u32 %v4608_v39, %v4203_v38  ;;  %v4616_v38 = vld [vmem:[%s6959_s3 + $0x2bc] sm:$0xf]  ;;  %v4241_v39 = vld [vmem:[%s6959_s3 + $0x2c4] sm:$0xf0] }
 0x12a   :  { %v3992_v19 = vor.u32 %v4553_v35, %v3989_v54  ;;  %v1846_v25 = vadd.f32 %v6594_v26, %v1833_v9  ;;  %v4043_v26 = vld [vmem:[%s6959_s3 + $0x128] sm:$0xf]  ;;  %v4611_v36 = vld [vmem:[%s6959_s3 + $0x290] sm:$0xf0]  ;;  %v4191_v54 = vld [vmem:[%s6959_s3 + $0x258] sm:$0xf] }
 0x12b   :  { %2740 = vmatpush.bf16.msrb.mxu1 %v4064_v57  ;;  %v1834_v37 = vpop.f32.mrf.mxu1  ;;  %2713 = vmatpush.bf16.msra.mxu3 %v4264_v58  ;;  %v4216_v30 = vor.u32 %v4611_v36, %v4215_v34  ;;  %v3923_v58 = vld [vmem:[%s6959_s3 + $0x38] sm:$0xf]  ;;  %v4192_v62 = vor.u32 %v4605_v55, %v4191_v54  ;;  %v4151_v34 = vld [vmem:[%s6959_s3 + $0x200] sm:$0xf]  ;;  %v4594_v36 = vld [vmem:[%s6959_s3 + $0x208] sm:$0xf0] }
 0x12c   :  { %2753 = vmatpush.bf16.msrb.mxu2 %v4160_v18  ;;  %v6596_v27 = vpop.f32.mrf.mxu3  ;;  %v4100_v18 = vor.u32 %v4580_v46, %v4097_v47  ;;  %v4031_v46 = vld [vmem:[%s6959_s3 + $0x110] sm:$0xf]  ;;  %v4564_v47 = vld [vmem:[%s6959_s3 + $0x118] sm:$0xf0]  ;;  %v4610_v55 = vld [vmem:[%s6959_s3 + $0x28c] sm:$0xf] }
 0x12d   :  { %2728 = vmatpush.bf16.msrb.mxu0 %v3956_v61  ;;  %v4577_v61 = vld [vmem:[%s6959_s3 + $0x184] sm:$0xf]  ;;  %v1859_v41 = vadd.f32 %v6596_v27, %v1846_v25  ;;  %v4540_v27 = vld [vmem:[%s6959_s3 + $0x58] sm:$0xf0]  ;;  %v4531_v25 = vld [vmem:[%s6959_s3 + $0x10] sm:$0xf0] }
 0x12f   :  { %2741 = vmatpush.bf16.msrb.mxu1 %v4052_v45  ;;  %v4085_v45 = vld [vmem:[%s6959_s3 + $0x18c] sm:$0xf0] }
 0x130   :  { %2754 = vmatpush.bf16.msrb.mxu2 %v4148_v22  ;;  %v4252_v22 = vor.u32 %v4620_v1, %v4251_v0  ;;  %v4088_v8 = vor.u32 %v4577_v61, %v4085_v45  ;;  %v4175_v61 = vld [vmem:[%s6959_s3 + $0x230] sm:$0xf]  ;;  %v4600_v1 = vld [vmem:[%s6959_s3 + $0x238] sm:$0xf0] }
 0x131   :  { %2729 = vmatpush.bf16.msrb.mxu0 %v3944_v2  ;;  %v1847_v57 = vpop.f32.mrf.mxu2  ;;  %v4080_v2 = vor.u32 %v4576_v59, %v4079_v53  ;;  %v4537_v53 = vld [vmem:[%s6959_s3 + $0x40] sm:$0xf0]  ;;  %v4019_v59 = vld [vmem:[%s6959_s3 + $0xf8] sm:$0xf]  ;;  %v4176_v9 = vor.u32 %v4600_v1, %v4175_v61  ;;  %v4582_v61 = vld [vmem:[%s6959_s3 + $0x1a8] sm:$0xf0] }
 0x132   :  { %2714 = vmatpush.bf16.msra.mxu3 %v4252_v22  ;;  %v4032_v57 = vor.u32 %v4564_v47, %v4031_v46  ;;  %v3924_v0 = vor.u32 %v4537_v53, %v3923_v58  ;;  %v4613_v46 = vld [vmem:[%s6959_s3 + $0x2a4] sm:$0xf]  ;;  %v4229_v47 = vld [vmem:[%s6959_s3 + $0x2ac] sm:$0xf0]  ;;  %v4607_v53 = vld [vmem:[%s6959_s3 + $0x274] sm:$0xf] }
 0x133   :  { %2742 = vmatpush.bf16.msrb.mxu1 %v4040_v5  ;;  %v4067_v5 = vld [vmem:[%s6959_s3 + $0x158] sm:$0xf]  ;;  %v4579_v1 = vld [vmem:[%s6959_s3 + $0x190] sm:$0xf0] }
 0x134   :  { %2755 = vmatpush.bf16.msrb.mxu2 %v4136_v14  ;;  %v1860_v60 = vpop.f32.mrf.mxu3  ;;  %v3972_v14 = vor.u32 %v4549_v4, %v3971_v3  ;;  %v4068_v16 = vor.u32 %v4573_v6, %v4067_v5  ;;  %v4534_v3 = vld [vmem:[%s6959_s3 + $0x28] sm:$0xf0]  ;;  %v4007_v5 = vld [vmem:[%s6959_s3 + $0xe0] sm:$0xf] }
 0x135   :  { %2730 = vmatpush.bf16.msrb.mxu0 %v3932_v15  ;;  %v4240_v15 = vor.u32 %v4617_v11, %v4239_v10  ;;  %v4561_v60 = vld [vmem:[%s6959_s3 + $0x100] sm:$0xf0]  ;;  %v4558_v6 = vld [vmem:[%s6959_s3 + $0xe8] sm:$0xf0] }
 0x136   :  { %v4020_v22 = vor.u32 %v4561_v60, %v4019_v59  ;;  %v4008_v23 = vor.u32 %v4558_v6, %v4007_v5  ;;  %v4205_v59 = vld [vmem:[%s6959_s3 + $0x27c] sm:$0xf0]  ;;  %v4601_v6 = vld [vmem:[%s6959_s3 + $0x244] sm:$0xf] }
 0x137   :  { %2743 = vmatpush.bf16.msrb.mxu1 %v4028_v17  ;;  %v3959_v17 = vld [vmem:[%s6959_s3 + $0x80] sm:$0xf]  ;;  %2715 = vmatpush.bf16.msra.mxu3 %v4240_v15  ;;  %v4265_v15 = vld [vmem:[%s6959_s3 + $0x2f4] sm:$0xf0] }
 0x138   :  { %2756 = vmatpush.bf16.msrb.mxu2 %v4124_v28  ;;  %v4228_v28 = vor.u32 %v4614_v12, %v4227_v7 }
 0x139   :  { %2731 = vmatpush.bf16.msrb.mxu0 %v3920_v29  ;;  %v3960_v29 = vor.u32 %v4546_v21, %v3959_v17  ;;  %v4597_v17 = vld [vmem:[%s6959_s3 + $0x220] sm:$0xf0] }
 0x13b   :  { %2744 = vmatpush.bf16.msrb.mxu1 %v4016_v32  ;;  %v4543_v32 = vld [vmem:[%s6959_s3 + $0x70] sm:$0xf0]  ;;  %2716 = vmatpush.bf16.msra.mxu3 %v4228_v28  ;;  %v3995_v28 = vld [vmem:[%s6959_s3 + $0xc8] sm:$0xf] }
 0x13c   :  { %2757 = vmatpush.bf16.msrb.mxu2 %v4112_v40  ;;  %v3948_v37 = vor.u32 %v4543_v32, %v3947_v31  ;;  %v4044_v40 = vor.u32 %v4567_v33, %v4043_v26  ;;  %v4253_v31 = vld [vmem:[%s6959_s3 + $0x2dc] sm:$0xf0]  ;;  %v3900_v33 = vor.u32 %v4531_v25, %v3899_v24 }
 0x13d   :  { %2732 = vmatpush.bf16.msrb.mxu0 %v3908_v42  ;;  %v3935_v42 = vld [vmem:[%s6959_s3 + $0x50] sm:$0xf] }
 0x13e   :  { %v3936_v51 = vor.u32 %v4540_v27, %v3935_v42  ;;  %v4139_v42 = vld [vmem:[%s6959_s3 + $0x1e8] sm:$0xf]  ;;  %v4591_v27 = vld [vmem:[%s6959_s3 + $0x1f0] sm:$0xf0] }
 0x13f   :  { %2745 = vmatpush.bf16.msrb.mxu1 %v4004_v48  ;;  %2717 = vmatpush.bf16.msra.mxu3 %v4216_v30 }
 0x140   :  { %2758 = vmatpush.bf16.msrb.mxu2 %v4100_v18 }
 0x141   :  { %2733 = vmatpush.bf16.msrb.mxu0 %v3896_v63  ;;  %v1871_v43 = vpop.f32.mrf.mxu0 }
 0x142   :  { %v1872_v48 = vadd.f32 %v1871_v43, %v1859_v41  ;;  %v4244_v43 = vor.u32 %v4616_v38, %v4241_v39 }
 0x143   :  { %2746 = vmatpush.bf16.msrb.mxu1 %v3992_v19  ;;  %v1884_v35 = vpop.f32.mrf.mxu1  ;;  %2718 = vmatpush.bf16.msra.mxu3 %v4204_v49  ;;  %v4179_v19 = vld [vmem:[%s6959_s3 + $0x240] sm:$0xf]  ;;  %v4588_v49 = vld [vmem:[%s6959_s3 + $0x1d8] sm:$0xf0] }
 0x144   :  { %2734 = vmatmul.bf16.vlgmr.msrb.gmra.mxu0 %v6516_v52  ;;  %2759 = vmatpush.bf16.msrb.mxu2 %v4088_v8  ;;  %v1885_v56 = vadd.f32 %v1884_v35, %v1872_v48  ;;  %v4140_v48 = vor.u32 %v4591_v27, %v4139_v42  ;;  %v4127_v35 = vld [vmem:[%s6959_s3 + $0x1d0] sm:$0xf]  ;;  %v4618_v42 = vld [vmem:[%s6959_s3 + $0x2c8] sm:$0xf0] }
 0x145   :  { %2778 = vmatpush.bf16.msra.mxu0 %v3984_v20  ;;  %v4602_v20 = vld [vmem:[%s6959_s3 + $0x248] sm:$0xf0]  ;;  %v4128_v54 = vor.u32 %v4588_v49, %v4127_v35  ;;  %v4223_v35 = vld [vmem:[%s6959_s3 + $0x290] sm:$0xf]  ;;  %v4612_v49 = vld [vmem:[%s6959_s3 + $0x298] sm:$0xf0] }
 0x146   :  { %2747 = vmatmul.bf16.vlgmr.msrb.gmra.mxu1 %v6512_v50  ;;  %v4180_v11 = vor.u32 %v4602_v20, %v4179_v19  ;;  %v4604_v19 = vld [vmem:[%s6959_s3 + $0x25c] sm:$0xf]  ;;  %v4193_v20 = vld [vmem:[%s6959_s3 + $0x264] sm:$0xf0] }
 0x147   :  { %2791 = vmatpush.bf16.msra.mxu1 %v4080_v2  ;;  %v3911_v2 = vld [vmem:[%s6959_s3 + $0x20] sm:$0xf]  ;;  %2719 = vmatpush.bf16.msra.mxu3 %v4192_v62  ;;  %v4208_v62 = vor.u32 %v4607_v53, %v4205_v59  ;;  %v4606_v59 = vld [vmem:[%s6959_s3 + $0x268] sm:$0xf0] }
 0x148   :  { %v3912_v12 = vor.u32 %v4534_v3, %v3911_v2  ;;  %v4196_v2 = vor.u32 %v4604_v19, %v4193_v20  ;;  %v4199_v53 = vld [vmem:[%s6959_s3 + $0x260] sm:$0xf] }
 0x149   :  { %2779 = vmatpush.bf16.msra.mxu0 %v3972_v14  ;;  %v1897_v18 = vpop.f32.mrf.mxu2  ;;  %v1873_v8 = vpop.f32.mrf.mxu0  ;;  %v4622_v14 = vld [vmem:[%s6959_s3 + $0x2ec] sm:$0xf] }
 0x14a   :  { %v1898_v63 = vadd.f32 %v1897_v18, %v1885_v56  ;;  %v4268_v21 = vor.u32 %v4622_v14, %v4265_v15  ;;  %v4217_v56 = vld [vmem:[%s6959_s3 + $0x294] sm:$0xf0]  ;;  %v4103_v18 = vld [vmem:[%s6959_s3 + $0x1a0] sm:$0xf]  ;;  %v4181_v8 = vld [vmem:[%s6959_s3 + $0x24c] sm:$0xf0] }
 0x14b   :  { %2792 = vmatpush.bf16.msra.mxu1 %v4068_v16  ;;  %v1886_v10 = vpop.f32.mrf.mxu1  ;;  %v4163_v16 = vld [vmem:[%s6959_s3 + $0x218] sm:$0xf]  ;;  %2720 = vmatpush.bf16.msra.mxu3 %v4180_v11  ;;  %v289_v11 = vperm.slane %v6619_v44, 3  ;;  %v4271_v44 = vld [vmem:[%s6959_s3 + $0x2f0] sm:$0xf] }
 0x14c   :  { %v1910_v45 = vpop.f32.mrf.mxu3  ;;  %v4164_v32 = vor.u32 %v4597_v17, %v4163_v16  ;;  %v4184_v10 = vor.u32 %v4601_v6, %v4181_v8 }
 0x14d   :  { %2780 = vmatpush.bf16.msra.mxu0 %v3960_v29  ;;  %v1911_v4 = vadd.f32 %v1910_v45, %v1898_v63  ;;  %v4555_v29 = vld [vmem:[%s6959_s3 + $0xd0] sm:$0xf0]  ;;  %v4104_v45 = vor.u32 %v4582_v61, %v4103_v18  ;;  %v4200_v18 = vor.u32 %v4606_v59, %v4199_v53  ;;  %v4187_v61 = vld [vmem:[%s6959_s3 + $0x248] sm:$0xf] }
 0x14f   :  { %2793 = vmatpush.bf16.msra.mxu1 %v4056_v13  ;;  %2020 = vst [vmem:[#allocation2 + $0x10] sm:$0x3f] %v1911_v4  ;;  %v6795_v7 = vpack.c.bf16 %v1911_v4, %v1911_v4  ;;  %v4619_v13 = vld [vmem:[%s6959_s3 + $0x2d4] sm:$0xf]  ;;  %2765 = vmatpush.bf16.msrb.mxu3 %v4268_v21 }
 0x150   :  { %v4256_v30 = vor.u32 %v4619_v13, %v4253_v31 }
 0x151   :  { %2781 = vmatpush.bf16.msra.mxu0 %v3948_v37  ;;  %2708 = vmatmul.bf16.vlgmr.msra.gmra.mxu2 %v6795_v7  ;;  %v1899_v26 = vpop.f32.mrf.mxu2  ;;  %v3996_v37 = vor.u32 %v4555_v29, %v3995_v28 }
 0x152   :  { %2804 = vmatpush.bf16.msra.mxu2 %v4176_v9 }
 0x153   :  { %2794 = vmatpush.bf16.msra.mxu1 %v4044_v40  ;;  %v4152_v40 = vor.u32 %v4594_v36, %v4151_v34  ;;  %2766 = vmatpush.bf16.msrb.mxu3 %v4256_v30  ;;  %v4621_v30 = vld [vmem:[%s6959_s3 + $0x2e0] sm:$0xf0] }
 0x154   :  { %v1912_v41 = vpop.f32.mrf.mxu3 }
 0x155   :  { %2782 = vmatpush.bf16.msra.mxu0 %v3936_v51  ;;  %v4232_v51 = vor.u32 %v4613_v46, %v4229_v47  ;;  %v4259_v41 = vld [vmem:[%s6959_s3 + $0x2d8] sm:$0xf]  ;;  %v4615_v46 = vld [vmem:[%s6959_s3 + $0x2b0] sm:$0xf0] }
 0x156   :  { %2805 = vmatpush.bf16.msra.mxu2 %v4164_v32  ;;  %v4260_v38 = vor.u32 %v4621_v30, %v4259_v41 }
 0x157   :  { %2795 = vmatpush.bf16.msra.mxu1 %v4032_v57  ;;  %2767 = vmatpush.bf16.msrb.mxu3 %v4244_v43  ;;  %v4220_v57 = vor.u32 %v4610_v55, %v4217_v56  ;;  %v4235_v43 = vld [vmem:[%s6959_s3 + $0x2a8] sm:$0xf] }
 0x158   :  { %v4236_v47 = vor.u32 %v4615_v46, %v4235_v43 }
 0x159   :  { %2783 = vmatpush.bf16.msra.mxu0 %v3924_v0  ;;  %v4091_v0 = vld [vmem:[%s6959_s3 + $0x188] sm:$0xf] }
 0x15a   :  { %2806 = vmatpush.bf16.msra.mxu2 %v4152_v40  ;;  %v4092_v4 = vor.u32 %v4579_v1, %v4091_v0  ;;  %v4247_v40 = vld [vmem:[%s6959_s3 + $0x2c0] sm:$0xf] }
 0x15b   :  { %2796 = vmatpush.bf16.msra.mxu1 %v4020_v22  ;;  %2768 = vmatpush.bf16.msrb.mxu3 %v4232_v51  ;;  %v4248_v27 = vor.u32 %v4618_v42, %v4247_v40 }
 0x15d   :  { %2784 = vmatpush.bf16.msra.mxu0 %v3912_v12 }
 0x15e   :  { %2807 = vmatpush.bf16.msra.mxu2 %v4140_v48  ;;  %v2154_v48 = vld [vmem:[%s6960_s4] sm:$0x7] }
 0x15f   :  { %2797 = vmatpush.bf16.msra.mxu1 %v4008_v23  ;;  %2769 = vmatpush.bf16.msrb.mxu3 %v4220_v57  ;;  %v2156_v51 = vperm.slane %v2154_v48, 0  ;;  %v2157_v1 = vperm.slane %v2154_v48, 1  ;;  %v2158_v6 = vperm.slane %v2154_v48, 2 }
 0x161   :  { %2785 = vmatpush.bf16.msra.mxu0 %v3900_v33  ;;  %2760 = vmatmul.bf16.vlgmr.msrb.gmra.mxu2 %v6795_v7  ;;  %v1923_v60 = vpop.f32.mrf.mxu0 }
 0x162   :  { %2808 = vmatpush.bf16.msra.mxu2 %v4128_v54  ;;  %v1924_v12 = vadd.f32 %v1923_v60, %v289_v11  ;;  %v4224_v54 = vor.u32 %v4612_v49, %v4223_v35 }
 0x163   :  { %2798 = vmatpush.bf16.msra.mxu1 %v3996_v37  ;;  %v1936_v63 = vpop.f32.mrf.mxu1  ;;  %2770 = vmatpush.bf16.msrb.mxu3 %v4208_v62  ;;  %v4603_v62 = vld [vmem:[%s6959_s3 + $0x250] sm:$0xf0] }
 0x164   :  { %2786 = vmatmul.bf16.vlgmr.msra.gmra.mxu0 %v6516_v52  ;;  %v4115_v52 = vld [vmem:[%s6959_s3 + $0x1b8] sm:$0xf]  ;;  %v1937_v16 = vadd.f32 %v1936_v63, %v1924_v12  ;;  %v4188_v0 = vor.u32 %v4603_v62, %v4187_v61 }
 0x166   :  { %2799 = vmatmul.bf16.vlgmr.msra.gmra.mxu1 %v6512_v50  ;;  %v4585_v50 = vld [vmem:[%s6959_s3 + $0x1c0] sm:$0xf0] }
 0x167   :  { %v4116_v58 = vor.u32 %v4585_v50, %v4115_v52  ;;  %2771 = vmatpush.bf16.msrb.mxu3 %v4196_v2  ;;  %v4211_v52 = vld [vmem:[%s6959_s3 + $0x278] sm:$0xf]  ;;  %v4609_v50 = vld [vmem:[%s6959_s3 + $0x280] sm:$0xf0] }
 0x169   :  { %2809 = vmatpush.bf16.msra.mxu2 %v4116_v58  ;;  %v1949_v22 = vpop.f32.mrf.mxu2  ;;  %v1925_v5 = vpop.f32.mrf.mxu0  ;;  %v4212_v58 = vor.u32 %v4609_v50, %v4211_v52 }
 0x16a   :  { %v1950_v17 = vadd.f32 %v1949_v22, %v1937_v16 }
 0x16b   :  { %v1938_v9 = vpop.f32.mrf.mxu1  ;;  %2772 = vmatpush.bf16.msrb.mxu3 %v4184_v10 }
 0x16c   :  { %v1962_v3 = vpop.f32.mrf.mxu3 }
 0x16d   :  { %2810 = vmatpush.bf16.msra.mxu2 %v4104_v45  ;;  %v1963_v21 = vadd.f32 %v1962_v3, %v1950_v17 }
 0x171   :  { %2811 = vmatpush.bf16.msra.mxu2 %v4092_v4  ;;  %v1951_v14 = vpop.f32.mrf.mxu2 }
 0x174   :  { %2812 = vmatmul.bf16.vlgmr.msra.gmra.mxu2 %v6795_v7  ;;  %v1964_v15 = vpop.f32.mrf.mxu3  ;;  %v4624_v7 = vld [vmem:[%s6959_s3 + $0x2f8] sm:$0xf0]  ;;  %s4681_s3 = smov [#allocation4]  }
 0x175   :  { %v4272_v34 = vor.u32 %v4624_v7, %v4271_v44  ;;  %s2849_s5 = sshll.u32 %s4681_s3, 4  ;;  %s2850_s5 = int_to_ptr.vmem [resolvable:$true] %s2849_s5 }
 0x181   :  { %v1975_v23 = vpop.f32.mrf.mxu0 }
 0x182   :  { %v1976_v25 = vadd.f32 %v1975_v23, %v1963_v21 }
 0x183   :  { %v1988_v24 = vpop.f32.mrf.mxu1 }
 0x184   :  { %v1989_v28 = vadd.f32 %v1988_v24, %v1976_v25 }
 0x189   :  { %v2001_v29 = vpop.f32.mrf.mxu2  ;;  %v1977_v32 = vpop.f32.mrf.mxu0 }
 0x18a   :  { %v2002_v13 = vadd.f32 %v2001_v29, %v1989_v28  ;;  %v2014_v31 = vpop.f32.mrf.mxu3 }
 0x18b   :  { %v1990_v26 = vpop.f32.mrf.mxu1 }
 0x18c   :  { %v2015_v33 = vadd.f32 %v2014_v31, %v2002_v13 }
 0x18e   :  { %2021 = vst [vmem:[#allocation2 + $0x18] sm:$0x3f] %v2015_v33  ;;  %v2025_v36 = vpack.c.bf16 %v2015_v33, %v2015_v33 }
 0x18f   :  { %2843 = dma.vmem_to_hbm [thread:$0]  %s2839_s30, 512, %s2841_s9, [#allocation3]  }
 0x190   :  { %2721 = vmatmul.bf16.vlgmr.msra.gmra.mxu3 %v2025_v36 }
 0x191   :  { %v2003_v37 = vpop.f32.mrf.mxu2  ;;  %2817 = vmatpush.bf16.msra.mxu3 %v4272_v34 }
 0x192   :  { %v2016_v39 = vpop.f32.mrf.mxu3 }
 0x195   :  { %2818 = vmatpush.bf16.msra.mxu3 %v4260_v38 }
 0x199   :  { %2819 = vmatpush.bf16.msra.mxu3 %v4248_v27 }
 0x19d   :  { %2820 = vmatpush.bf16.msra.mxu3 %v4236_v47 }
 0x1a0   :  { %2773 = vmatmul.bf16.vlgmr.msrb.gmra.mxu3 %v2025_v36 }
 0x1a1   :  { %v2683_v55 = vpop.f32.mrf.mxu0  ;;  %2821 = vmatpush.bf16.msra.mxu3 %v4224_v54 }
 0x1a2   :  { %v2684_v56 = vadd.f32 %v2683_v55, %v2156_v51 }
 0x1a3   :  { %v2696_v57 = vpop.f32.mrf.mxu1 }
 0x1a4   :  { %v2697_v60 = vadd.f32 %v2696_v57, %v2684_v56 }
 0x1a5   :  { %2822 = vmatpush.bf16.msra.mxu3 %v4212_v58 }
 0x1a9   :  { %v2685_v63 = vpop.f32.mrf.mxu0  ;;  %2823 = vmatpush.bf16.msra.mxu3 %v4200_v18 }
 0x1ab   :  { %v2698_v45 = vpop.f32.mrf.mxu1 }
 0x1ad   :  { %2824 = vmatpush.bf16.msra.mxu3 %v4188_v0 }
 0x1b0   :  { %2825 = vmatmul.bf16.vlgmr.msra.gmra.mxu3 %v2025_v36 }
 0x1c1   :  { %v2735_v19 = vpop.f32.mrf.mxu0 }
 0x1c2   :  { %v2736_v20 = vadd.f32 %v2735_v19, %v2157_v1 }
 0x1c3   :  { %v2748_v22 = vpop.f32.mrf.mxu1 }
 0x1c4   :  { %v2749_v2 = vadd.f32 %v2748_v22, %v2736_v20 }
 0x1c9   :  { %v2737_v3 = vpop.f32.mrf.mxu0 }
 0x1cb   :  { %v2750_v4 = vpop.f32.mrf.mxu1 }
 0x1d4   :  { %v2709_v5 = vpop.f32.mrf.mxu2 }
 0x1d5   :  { %v2710_v24 = vadd.f32 %v2709_v5, %v2697_v60 }
 0x1dc   :  { %v2711_v14 = vpop.f32.mrf.mxu2 }
 0x1e1   :  { %v2787_v8 = vpop.f32.mrf.mxu0 }
 0x1e2   :  { %v2788_v9 = vadd.f32 %v2787_v8, %v2158_v6 }
 0x1e3   :  { %v2800_v10 = vpop.f32.mrf.mxu1 }
 0x1e4   :  { %v2801_v11 = vadd.f32 %v2800_v10, %v2788_v9  ;;  %v2761_v16 = vpop.f32.mrf.mxu2 }
 0x1e5   :  { %v2762_v13 = vadd.f32 %v2761_v16, %v2749_v2 }
 0x1e9   :  { %v2789_v15 = vpop.f32.mrf.mxu0 }
 0x1eb   :  { %v2802_v12 = vpop.f32.mrf.mxu1 }
 0x1ec   :  { %v2763_v17 = vpop.f32.mrf.mxu2 }
 0x1f7   :  { %v2813_v21 = vpop.f32.mrf.mxu2 }
 0x1f8   :  { %v2814_v7 = vadd.f32 %v2813_v21, %v2801_v11 }
 0x1ff   :  { %v2815_v23 = vpop.f32.mrf.mxu2 }
 0x213   :  { %v2722_v25 = vpop.f32.mrf.mxu3 }
 0x214   :  { %v2723_v28 = vadd.f32 %v2722_v25, %v2710_v24 }
 0x216   :  { %2830 = vst [vmem:[#allocation4] sm:$0x3f] %v2723_v28 }
 0x21b   :  { %v2724_v29 = vpop.f32.mrf.mxu3 }
 0x223   :  { %v2774_v31 = vpop.f32.mrf.mxu3 }
 0x224   :  { %v2775_v32 = vadd.f32 %v2774_v31, %v2762_v13 }
 0x226   :  { %2831 = vst [vmem:[#allocation4 + $0x8] sm:$0x3f] %v2775_v32 }
 0x22b   :  { %v2776_v44 = vpop.f32.mrf.mxu3 }
 0x233   :  { %v2826_v26 = vpop.f32.mrf.mxu3 }
 0x234   :  { %v2827_v33 = vadd.f32 %v2826_v26, %v2814_v7 }
 0x236   :  { %2832 = vst [vmem:[#allocation4 + $0x10] sm:$0x3f] %v2827_v33 }
 0x237   :  { %2854 = dma.vmem_to_hbm [thread:$0]  %s2850_s5, 384, %s2852_s12, [#allocation5]  }
 0x23b   :  { %v2828_v34 = vpop.f32.mrf.mxu3 }
 0x23c   :  { %4676 = dma.done.wait [#allocation3], 512  }
 0x23d   :  { %4677 = vsyncadd [#allocation3], 4294966784 }
 0x23e   :  { %4678 = dma.done.wait [#allocation5], 384  }
 0x23f   :  { %4679 = vsyncadd [#allocation5], 4294966912 }
 0x240   :  { %2863 = vsyncpa [#allocation3], 1 }
 0x241   :  { %2864 = vsyncpa [#allocation5], 1 }

</bundles_post_ra>
